<compile_context>
chip_gen: v5e
topology: v5e:2x2
jax: 0.10.0
libtpu: 0.0.40
codegen_flags: <defaults>
</compile_context>

<pallas_src>
import functools

import jax
import jax.numpy as jnp
from jax.experimental import pallas as pl
from jax.experimental.pallas import tpu as pltpu


# ---------------------------------------------------------------------------
# Pallas kernel: fused embedding + bidirectional GRU (packed semantics) + FC
# ---------------------------------------------------------------------------
def gru_fc_kernel(T, B, H, V,
                  lens_ref, tokf_ref, tokb_ref,
                  wemb_ref, whh_ref, bin_ref, bhn_ref,
                  fcw_ref, fcb_ref,
                  out_ref,
                  proj_ref):
    """
    lens_ref : (B, 1)       int32  sequence lengths
    tokf_ref : (T*B, 1)     int32  time-major token ids (row t*B+b = step t)
    tokb_ref : (T*B, 1)     int32  time-reversed token ids (row t*B+b = step T-1-t)
    wemb_ref : (3, 2V, 2H)  bf16   per gate g: blockdiag(table@Wi_f[g], table@Wi_b[g])
    whh_ref  : (3, 2H, 2H)  bf16   per gate g: blockdiag(Wh_f[g], Wh_b[g])
    bin_ref  : (3, 1, 2H)   f32    [b_ir+b_hr, b_iz+b_hz, b_in], fwd lanes ++ bwd lanes
    bhn_ref  : (1, 2H)      f32    b_hn, fwd lanes ++ bwd lanes
    fcw_ref  : (2H, OP)     bf16   FC weights, rows reordered to [h_fwd ; h_bwd], lane-padded
    fcb_ref  : (1, OP)      f32
    out_ref  : (B, OP)      f32
    proj_ref : (3, T*B, 2H) f32    VMEM scratch: hoisted input projections [r, z, n]
    """
    H2 = 2 * H
    TB = T * B

    # ---- fused embedding gather + input projection, hoisted off the recurrence ----
    # one-hot over [fwd vocab | bwd vocab]: row t*B+b has ones at tok[t,b] and
    # V + tok[T-1-t,b]; gather == one-hot @ (table-premultiplied gate weights).
    lane_v = jax.lax.broadcasted_iota(jnp.int32, (TB, 2 * V), 1)
    hot = (lane_v == tokf_ref[...]) | (lane_v == tokb_ref[...] + V)
    onehot = jnp.where(hot, 1.0, 0.0).astype(jnp.bfloat16)
    for g in range(3):                                   # gate order [r, z, n]
        proj_ref[g] = (jnp.dot(onehot, wemb_ref[g],
                               preferred_element_type=jnp.float32) + bin_ref[g])

    lens = lens_ref[...]                                            # (B, 1) int32
    fwd_lanes = jax.lax.broadcasted_iota(jnp.int32, (B, H2), 1) < H  # lanes [0,H) = fwd

    def sigmoid_1tanh(x):                     # sigmoid via a single EUP tanh
        return 0.5 * jnp.tanh(0.5 * x) + 0.5

    # ---- one fused fwd/bwd GRU step: only h @ Whh stays on the serial chain ----
    def step(h, i):
        tf, tb = i, T - 1 - i                                       # fwd / bwd time
        rows = slice(i * B, (i + 1) * B)                            # static, sublane-aligned
        hb16 = h.astype(jnp.bfloat16)
        r = sigmoid_1tanh(proj_ref[0, rows, :] +
                          jnp.dot(hb16, whh_ref[0], preferred_element_type=jnp.float32))
        z = sigmoid_1tanh(proj_ref[1, rows, :] +
                          jnp.dot(hb16, whh_ref[1], preferred_element_type=jnp.float32))
        n = jnp.tanh(proj_ref[2, rows, :] + r *
                     (jnp.dot(hb16, whh_ref[2], preferred_element_type=jnp.float32)
                      + bhn_ref[...]))
        h_new = (1.0 - z) * n + z * h
        # pack_padded_sequence semantics: fwd lanes gated by step tf, bwd lanes by tb
        t_lane = jnp.where(fwd_lanes, tf, tb)                       # (B, 2H) int32
        return jnp.where(lens > t_lane, h_new, h)

    h = jnp.zeros((B, H2), jnp.float32)                             # [h_fwd | h_bwd]
    for i in range(T):                                              # fully unrolled (T static)
        h = step(h, i)

    # ---- FC head: cat([h_bwd, h_fwd]) @ W + b (rows of fcw pre-reordered) ----
    out_ref[...] = (jnp.dot(h.astype(jnp.bfloat16), fcw_ref[...],
                            preferred_element_type=jnp.float32) + fcb_ref[...])


# ---------------------------------------------------------------------------
# One-time parameter re-layout (hoisted out of the per-call forward path)
# ---------------------------------------------------------------------------
def prepare_params(params, output_size):
    table = params["embedding"].astype(jnp.float32)                 # (V, H)
    V, H = table.shape

    def split_gates(w):                                             # (H,3H) -> (3,H,H), [r,z,n]
        return jnp.transpose(w.reshape(H, 3, H), (1, 0, 2))

    def blockdiag(a, b):
        top = jnp.concatenate([a, jnp.zeros((a.shape[0], b.shape[1]), jnp.float32)], 1)
        bot = jnp.concatenate([jnp.zeros((b.shape[0], a.shape[1]), jnp.float32), b], 1)
        return jnp.concatenate([top, bot], 0)

    wih_f, wih_b = split_gates(params["w_ih_f"]), split_gates(params["w_ih_b"])
    whh_f, whh_b = split_gates(params["w_hh_f"]), split_gates(params["w_hh_b"])

    # fold the embedding table into the input projections:
    #   emb[tok] @ Wi  ==  onehot(tok) @ (table @ Wi)
    # TODO(synk): for large vocabularies keep the table in HBM and DMA-gather the
    # T*B needed rows instead of pre-multiplying it into the gate weights.
    wemb = jnp.stack([blockdiag(table @ wih_f[g], table @ wih_b[g]) for g in range(3)])
    whh = jnp.stack([blockdiag(whh_f[g], whh_b[g]) for g in range(3)])

    bi_f, bh_f = params["b_ih_f"].reshape(3, 1, H), params["b_hh_f"].reshape(3, 1, H)
    bi_b, bh_b = params["b_ih_b"].reshape(3, 1, H), params["b_hh_b"].reshape(3, 1, H)
    cat = lambda a, b: jnp.concatenate([a, b], axis=-1)
    bin_ = jnp.stack([cat(bi_f[0] + bh_f[0], bi_b[0] + bh_b[0]),
                      cat(bi_f[1] + bh_f[1], bi_b[1] + bh_b[1]),
                      cat(bi_f[2], bi_b[2])])                       # (3, 1, 2H)
    bhn = cat(bh_f[2], bh_b[2])                                     # (1, 2H)

    # FC: PyTorch uses cat([h_bwd, h_fwd]); the kernel carries [h_fwd | h_bwd],
    # so reorder fc_w rows.  Pad to a lane-dense (multiple-of-128) output width.
    OP = ((output_size + 127) // 128) * 128
    fcw = jnp.concatenate([params["fc_w"][H:], params["fc_w"][:H]], axis=0)   # (2H, O)
    fcw = jnp.pad(fcw, ((0, 0), (0, OP - output_size)))
    fcb = jnp.pad(params["fc_b"], ((0, 0), (0, OP - output_size)))

    return {
        "wemb": wemb.astype(jnp.bfloat16),      # (3, 2V, 2H)
        "whh": whh.astype(jnp.bfloat16),        # (3, 2H, 2H)
        "bin": bin_.astype(jnp.float32),        # (3, 1, 2H)
        "bhn": bhn.astype(jnp.float32),         # (1, 2H)
        "fcw": fcw.astype(jnp.bfloat16),        # (2H, OP)
        "fcb": fcb.astype(jnp.float32),         # (1, OP)
    }


# ---------------------------------------------------------------------------
# Per-call wrapper: only token/length re-layout (tiny int arrays) stays here
# ---------------------------------------------------------------------------
@functools.partial(jax.jit, static_argnames=("output_size",))
def rnn_classifier_forward(tokens, seq_lengths, prepared, *, output_size):
    B, T = tokens.shape
    H = prepared["whh"].shape[-1] // 2
    V = prepared["wemb"].shape[1] // 2
    OP = prepared["fcw"].shape[-1]

    tok_tm = jnp.transpose(tokens.astype(jnp.int32))                # (T, B) time-major
    tok_f = tok_tm.reshape(T * B, 1)
    tok_b = tok_tm[::-1].reshape(T * B, 1)                          # time-reversed
    lens = seq_lengths.astype(jnp.int32).reshape(B, 1)

    vmem = pl.BlockSpec(memory_space=pltpu.MemorySpace.VMEM)
    kernel = functools.partial(gru_fc_kernel, T, B, H, V)
    # TODO(synk): when B grows to >=2 batch tiles, add a leading grid axis over batch
    # tiles with dimension_semantics=("parallel",) so v7x's second TensorCore is used;
    # at B=8 a single gridless call is optimal.
    out = pl.pallas_call(
        kernel,
        out_shape=jax.ShapeDtypeStruct((B, OP), jnp.float32),
        in_specs=[vmem] * 9,
        out_specs=vmem,
        scratch_shapes=[pltpu.VMEM((3, T * B, 2 * H), jnp.float32)],
    )(lens, tok_f, tok_b,
      prepared["wemb"], prepared["whh"], prepared["bin"], prepared["bhn"],
      prepared["fcw"], prepared["fcb"])
    return out[:, :output_size]


# ---------------------------------------------------------------------------
# Pure-JAX reference (mirrors the PyTorch RNNClassifier forward exactly)
# ---------------------------------------------------------------------------
def rnn_classifier_reference(tokens, seq_lengths, params):
    B, T = tokens.shape
    H = params["embedding"].shape[1]
    emb = params["embedding"][tokens].astype(jnp.float32)           # (B, T, H)
    emb = jnp.transpose(emb, (1, 0, 2))                             # (T, B, H)
    lens = seq_lengths.astype(jnp.int32)

    def cell(x, h, w_ih, w_hh, b_ih, b_hh):
        gi = jnp.dot(x, w_ih, precision="highest") + b_ih
        gh = jnp.dot(h, w_hh, precision="highest") + b_hh
        i_r, i_z, i_n = jnp.split(gi, 3, axis=1)
        h_r, h_z, h_n = jnp.split(gh, 3, axis=1)
        r = jax.nn.sigmoid(i_r + h_r)
        z = jax.nn.sigmoid(i_z + h_z)
        n = jnp.tanh(i_n + r * h_n)
        return (1.0 - z) * n + z * h

    hf = jnp.zeros((B, H), jnp.float32)
    hb = jnp.zeros((B, H), jnp.float32)
    for t in range(T):
        mask = (t < lens)[:, None]
        hf = jnp.where(mask, cell(emb[t], hf, params["w_ih_f"], params["w_hh_f"],
                                  params["b_ih_f"], params["b_hh_f"]), hf)
    for i in range(T):
        t = T - 1 - i
        mask = (t < lens)[:, None]
        hb = jnp.where(mask, cell(emb[t], hb, params["w_ih_b"], params["w_hh_b"],
                                  params["b_ih_b"], params["b_hh_b"]), hb)

    hidden_cat = jnp.concatenate([hb, hf], axis=1)                  # [hidden[-1], hidden[-2]]
    return jnp.dot(hidden_cat, params["fc_w"], precision="highest") + params["fc_b"]


# ---------------------------------------------------------------------------
# Deterministic parameter init (shapes from RNNClassifier.__init__)
# ---------------------------------------------------------------------------
def init_params(key, input_size, hidden_size, output_size):
    H = hidden_size
    keys = jax.random.split(key, 11)
    s = 1.0 / jnp.sqrt(H)

    def u(k, shape):
        return jax.random.uniform(k, shape, jnp.float32, -s, s)

    return {
        # torch.nn.Embedding(input_size, hidden_size)
        "embedding": jax.random.normal(keys[0], (input_size, H), jnp.float32),
        # torch.nn.GRU(H, H, 1, bidirectional=True); stored transposed (x @ W), gates [r,z,n]
        "w_ih_f": u(keys[1], (H, 3 * H)),
        "w_hh_f": u(keys[2], (H, 3 * H)),
        "b_ih_f": u(keys[3], (1, 3 * H)),
        "b_hh_f": u(keys[4], (1, 3 * H)),
        "w_ih_b": u(keys[5], (H, 3 * H)),
        "w_hh_b": u(keys[6], (H, 3 * H)),
        "b_ih_b": u(keys[7], (1, 3 * H)),
        "b_hh_b": u(keys[8], (1, 3 * H)),
        # torch.nn.Linear(2H, output_size); stored transposed for x @ W
        "fc_w": u(keys[9], (2 * H, output_size)),
        "fc_b": u(keys[10], (1, output_size)),
    }


if __name__ == "__main__":
    INPUT_SIZE = 32    # vocab size
    HIDDEN = 32
    OUTPUT = 8
    B, T = 8, 8

    key = jax.random.PRNGKey(0)
    k_tok, k_par = jax.random.split(key)

    params = init_params(k_par, INPUT_SIZE, HIDDEN, OUTPUT)
    prepared = prepare_params(params, OUTPUT)        # one-time re-layout, cached with weights

    # tokens (B, T) int32; lengths sorted descending (pack_padded_sequence requirement)
    tokens = jax.random.randint(k_tok, (B, T), 0, INPUT_SIZE, dtype=jnp.int32)
    seq_lengths = jnp.array([8, 7, 6, 5, 4, 3, 2, 1], dtype=jnp.int32)

    out = rnn_classifier_forward(tokens, seq_lengths, prepared, output_size=OUTPUT)
    out = jax.block_until_ready(out)
    assert out.shape == (B, OUTPUT) and out.dtype == jnp.float32

    # Sanity check against a pure-JAX f32 reference of the PyTorch forward pass.
    # bf16 MXU operands (with f32 accumulation / f32 hidden carry) are the only
    # reduced-precision path, hence the relaxed tolerance.
    ref = jax.block_until_ready(rnn_classifier_reference(tokens, seq_lengths, params))
    assert bool(jnp.all(jnp.isfinite(out)))
    assert bool(jnp.allclose(out, ref, rtol=2e-2, atol=3e-2)), \
        f"max abs diff = {float(jnp.max(jnp.abs(out - ref)))}"

    print("KERNEL_OK")
</pallas_src>

<mosaic_0001>
module attributes {stable_mosaic.version = 11 : i64} {
  func.func @gru_fc_kernel(%arg0: memref<8x1xi32, #tpu.memory_space<vmem>>, %arg1: memref<64x1xi32, #tpu.memory_space<vmem>>, %arg2: memref<64x1xi32, #tpu.memory_space<vmem>>, %arg3: memref<3x64x64xbf16, #tpu.memory_space<vmem>>, %arg4: memref<3x64x64xbf16, #tpu.memory_space<vmem>>, %arg5: memref<3x1x64xf32, #tpu.memory_space<vmem>>, %arg6: memref<1x64xf32, #tpu.memory_space<vmem>>, %arg7: memref<64x128xbf16, #tpu.memory_space<vmem>>, %arg8: memref<1x128xf32, #tpu.memory_space<vmem>>, %arg9: memref<8x128xf32, #tpu.memory_space<vmem>>, %arg10: memref<3x64x64xf32, #tpu.memory_space<vmem>>) attributes {dimension_semantics = [], scalar_prefetch = 0 : i64, scratch_operands = 1 : i64, tpu.core_type = #tpu.core_type<tc>} {
    %0 = tpu.iota {dimensions = array<i32: 1>} : vector<64x64xi32>
    %c0 = arith.constant 0 : index
    %c0_0 = arith.constant 0 : index
    %1 = vector.load %arg1[%c0, %c0_0] : memref<64x1xi32, #tpu.memory_space<vmem>>, vector<64x1xi32>
    %2 = vector.broadcast %1 : vector<64x1xi32> to vector<64x64xi32>
    %3 = arith.cmpi eq, %0, %2 : vector<64x64xi32>
    %c0_1 = arith.constant 0 : index
    %c0_2 = arith.constant 0 : index
    %4 = vector.load %arg2[%c0_1, %c0_2] : memref<64x1xi32, #tpu.memory_space<vmem>>, vector<64x1xi32>
    %c32_i32 = arith.constant 32 : i32
    %5 = vector.broadcast %c32_i32 : i32 to vector<64x1xi32>
    %6 = arith.addi %4, %5 : vector<64x1xi32>
    %7 = vector.broadcast %6 : vector<64x1xi32> to vector<64x64xi32>
    %8 = arith.cmpi eq, %0, %7 : vector<64x64xi32>
    %9 = arith.ori %3, %8 : vector<64x64xi1>
    %cst = arith.constant 1.000000e+00 : f32
    %cst_3 = arith.constant 0.000000e+00 : f32
    %10 = vector.broadcast %cst : f32 to vector<64x64xf32>
    %11 = vector.broadcast %cst_3 : f32 to vector<64x64xf32>
    %12 = arith.select %9, %10, %11 : vector<64x64xi1>, vector<64x64xf32>
    %13 = arith.truncf %12 : vector<64x64xf32> to vector<64x64xbf16>
    %c0_4 = arith.constant 0 : index
    %c0_5 = arith.constant 0 : index
    %c0_6 = arith.constant 0 : index
    %14 = vector.load %arg3[%c0_4, %c0_5, %c0_6] : memref<3x64x64xbf16, #tpu.memory_space<vmem>>, vector<1x64x64xbf16>
    %15 = vector.shape_cast %14 : vector<1x64x64xbf16> to vector<64x64xbf16>
    %cst_7 = arith.constant dense<0.000000e+00> : vector<64x64xf32>
    %16 = tpu.matmul %13, %15, %cst_7 {dimension_numbers = #tpu.dot_dimension_numbers<[1], [0], [0], [1], [0, 0, 1, 1], [], []>} : vector<64x64xbf16>, vector<64x64xbf16>, vector<64x64xf32> -> vector<64x64xf32>
    %c0_8 = arith.constant 0 : index
    %c0_9 = arith.constant 0 : index
    %c0_10 = arith.constant 0 : index
    %17 = vector.load %arg5[%c0_8, %c0_9, %c0_10] : memref<3x1x64xf32, #tpu.memory_space<vmem>>, vector<1x1x64xf32>
    %18 = vector.shape_cast %17 : vector<1x1x64xf32> to vector<1x64xf32>
    %19 = vector.broadcast %18 : vector<1x64xf32> to vector<64x64xf32>
    %20 = arith.addf %16, %19 : vector<64x64xf32>
    %c0_11 = arith.constant 0 : index
    %c0_12 = arith.constant 0 : index
    %c0_13 = arith.constant 0 : index
    %21 = vector.load %arg10[%c0_11, %c0_12, %c0_13] : memref<3x64x64xf32, #tpu.memory_space<vmem>>, vector<1x64x64xf32>
    %22 = vector.shape_cast %21 : vector<1x64x64xf32> to vector<64x64xf32>
    %23 = vector.shape_cast %20 : vector<64x64xf32> to vector<1x64x64xf32>
    tpu.vector_store %arg10[%c0_11, %c0_12, %c0_13], %23 {strides = array<i32>} : memref<3x64x64xf32, #tpu.memory_space<vmem>>, vector<1x64x64xf32>,
    %c1 = arith.constant 1 : index
    %c0_14 = arith.constant 0 : index
    %c0_15 = arith.constant 0 : index
    %24 = vector.load %arg3[%c1, %c0_14, %c0_15] : memref<3x64x64xbf16, #tpu.memory_space<vmem>>, vector<1x64x64xbf16>
    %25 = vector.shape_cast %24 : vector<1x64x64xbf16> to vector<64x64xbf16>
    %cst_16 = arith.constant dense<0.000000e+00> : vector<64x64xf32>
    %26 = tpu.matmul %13, %25, %cst_16 {dimension_numbers = #tpu.dot_dimension_numbers<[1], [0], [0], [1], [0, 0, 1, 1], [], []>} : vector<64x64xbf16>, vector<64x64xbf16>, vector<64x64xf32> -> vector<64x64xf32>
    %c1_17 = arith.constant 1 : index
    %c0_18 = arith.constant 0 : index
    %c0_19 = arith.constant 0 : index
    %27 = vector.load %arg5[%c1_17, %c0_18, %c0_19] : memref<3x1x64xf32, #tpu.memory_space<vmem>>, vector<1x1x64xf32>
    %28 = vector.shape_cast %27 : vector<1x1x64xf32> to vector<1x64xf32>
    %29 = vector.broadcast %28 : vector<1x64xf32> to vector<64x64xf32>
    %30 = arith.addf %26, %29 : vector<64x64xf32>
    %c1_20 = arith.constant 1 : index
    %c0_21 = arith.constant 0 : index
    %c0_22 = arith.constant 0 : index
    %31 = vector.load %arg10[%c1_20, %c0_21, %c0_22] : memref<3x64x64xf32, #tpu.memory_space<vmem>>, vector<1x64x64xf32>
    %32 = vector.shape_cast %31 : vector<1x64x64xf32> to vector<64x64xf32>
    %33 = vector.shape_cast %30 : vector<64x64xf32> to vector<1x64x64xf32>
    tpu.vector_store %arg10[%c1_20, %c0_21, %c0_22], %33 {strides = array<i32>} : memref<3x64x64xf32, #tpu.memory_space<vmem>>, vector<1x64x64xf32>,
    %c2 = arith.constant 2 : index
    %c0_23 = arith.constant 0 : index
    %c0_24 = arith.constant 0 : index
    %34 = vector.load %arg3[%c2, %c0_23, %c0_24] : memref<3x64x64xbf16, #tpu.memory_space<vmem>>, vector<1x64x64xbf16>
    %35 = vector.shape_cast %34 : vector<1x64x64xbf16> to vector<64x64xbf16>
    %cst_25 = arith.constant dense<0.000000e+00> : vector<64x64xf32>
    %36 = tpu.matmul %13, %35, %cst_25 {dimension_numbers = #tpu.dot_dimension_numbers<[1], [0], [0], [1], [0, 0, 1, 1], [], []>} : vector<64x64xbf16>, vector<64x64xbf16>, vector<64x64xf32> -> vector<64x64xf32>
    %c2_26 = arith.constant 2 : index
    %c0_27 = arith.constant 0 : index
    %c0_28 = arith.constant 0 : index
    %37 = vector.load %arg5[%c2_26, %c0_27, %c0_28] : memref<3x1x64xf32, #tpu.memory_space<vmem>>, vector<1x1x64xf32>
    %38 = vector.shape_cast %37 : vector<1x1x64xf32> to vector<1x64xf32>
    %39 = vector.broadcast %38 : vector<1x64xf32> to vector<64x64xf32>
    %40 = arith.addf %36, %39 : vector<64x64xf32>
    %c2_29 = arith.constant 2 : index
    %c0_30 = arith.constant 0 : index
    %c0_31 = arith.constant 0 : index
    %41 = vector.load %arg10[%c2_29, %c0_30, %c0_31] : memref<3x64x64xf32, #tpu.memory_space<vmem>>, vector<1x64x64xf32>
    %42 = vector.shape_cast %41 : vector<1x64x64xf32> to vector<64x64xf32>
    %43 = vector.shape_cast %40 : vector<64x64xf32> to vector<1x64x64xf32>
    tpu.vector_store %arg10[%c2_29, %c0_30, %c0_31], %43 {strides = array<i32>} : memref<3x64x64xf32, #tpu.memory_space<vmem>>, vector<1x64x64xf32>,
    %c0_32 = arith.constant 0 : index
    %c0_33 = arith.constant 0 : index
    %44 = vector.load %arg0[%c0_32, %c0_33] : memref<8x1xi32, #tpu.memory_space<vmem>>, vector<8x1xi32>
    %45 = tpu.iota {dimensions = array<i32: 1>} : vector<8x64xi32>
    %c32_i32_34 = arith.constant 32 : i32
    %46 = vector.broadcast %c32_i32_34 : i32 to vector<8x64xi32>
    %47 = arith.cmpi slt, %45, %46 : vector<8x64xi32>
    %cst_35 = arith.constant 0.000000e+00 : f32
    %48 = vector.broadcast %cst_35 : f32 to vector<8x64xf32>
    %49 = arith.truncf %48 : vector<8x64xf32> to vector<8x64xbf16>
    %c0_36 = arith.constant 0 : index
    %c0_37 = arith.constant 0 : index
    %c0_38 = arith.constant 0 : index
    %50 = vector.load %arg10[%c0_36, %c0_37, %c0_38] : memref<3x64x64xf32, #tpu.memory_space<vmem>>, vector<1x8x64xf32>
    %51 = vector.shape_cast %50 : vector<1x8x64xf32> to vector<8x64xf32>
    %c0_39 = arith.constant 0 : index
    %c0_40 = arith.constant 0 : index
    %c0_41 = arith.constant 0 : index
    %52 = vector.load %arg4[%c0_39, %c0_40, %c0_41] : memref<3x64x64xbf16, #tpu.memory_space<vmem>>, vector<1x64x64xbf16>
    %53 = vector.shape_cast %52 : vector<1x64x64xbf16> to vector<64x64xbf16>
    %cst_42 = arith.constant dense<0.000000e+00> : vector<8x64xf32>
    %54 = tpu.matmul %49, %53, %cst_42 {dimension_numbers = #tpu.dot_dimension_numbers<[1], [0], [0], [1], [0, 0, 1, 1], [], []>} : vector<8x64xbf16>, vector<64x64xbf16>, vector<8x64xf32> -> vector<8x64xf32>
    %55 = arith.addf %51, %54 : vector<8x64xf32>
    %cst_43 = arith.constant 5.000000e-01 : f32
    %56 = vector.broadcast %cst_43 : f32 to vector<8x64xf32>
    %57 = arith.mulf %56, %55 : vector<8x64xf32>
    %58 = math.tanh %57 : vector<8x64xf32>
    %cst_44 = arith.constant 5.000000e-01 : f32
    %59 = vector.broadcast %cst_44 : f32 to vector<8x64xf32>
    %60 = arith.mulf %59, %58 : vector<8x64xf32>
    %cst_45 = arith.constant 5.000000e-01 : f32
    %61 = vector.broadcast %cst_45 : f32 to vector<8x64xf32>
    %62 = arith.addf %60, %61 : vector<8x64xf32>
    %c1_46 = arith.constant 1 : index
    %c0_47 = arith.constant 0 : index
    %c0_48 = arith.constant 0 : index
    %63 = vector.load %arg10[%c1_46, %c0_47, %c0_48] : memref<3x64x64xf32, #tpu.memory_space<vmem>>, vector<1x8x64xf32>
    %64 = vector.shape_cast %63 : vector<1x8x64xf32> to vector<8x64xf32>
    %c1_49 = arith.constant 1 : index
    %c0_50 = arith.constant 0 : index
    %c0_51 = arith.constant 0 : index
    %65 = vector.load %arg4[%c1_49, %c0_50, %c0_51] : memref<3x64x64xbf16, #tpu.memory_space<vmem>>, vector<1x64x64xbf16>
    %66 = vector.shape_cast %65 : vector<1x64x64xbf16> to vector<64x64xbf16>
    %cst_52 = arith.constant dense<0.000000e+00> : vector<8x64xf32>
    %67 = tpu.matmul %49, %66, %cst_52 {dimension_numbers = #tpu.dot_dimension_numbers<[1], [0], [0], [1], [0, 0, 1, 1], [], []>} : vector<8x64xbf16>, vector<64x64xbf16>, vector<8x64xf32> -> vector<8x64xf32>
    %68 = arith.addf %64, %67 : vector<8x64xf32>
    %cst_53 = arith.constant 5.000000e-01 : f32
    %69 = vector.broadcast %cst_53 : f32 to vector<8x64xf32>
    %70 = arith.mulf %69, %68 : vector<8x64xf32>
    %71 = math.tanh %70 : vector<8x64xf32>
    %cst_54 = arith.constant 5.000000e-01 : f32
    %72 = vector.broadcast %cst_54 : f32 to vector<8x64xf32>
    %73 = arith.mulf %72, %71 : vector<8x64xf32>
    %cst_55 = arith.constant 5.000000e-01 : f32
    %74 = vector.broadcast %cst_55 : f32 to vector<8x64xf32>
    %75 = arith.addf %73, %74 : vector<8x64xf32>
    %c2_56 = arith.constant 2 : index
    %c0_57 = arith.constant 0 : index
    %c0_58 = arith.constant 0 : index
    %76 = vector.load %arg10[%c2_56, %c0_57, %c0_58] : memref<3x64x64xf32, #tpu.memory_space<vmem>>, vector<1x8x64xf32>
    %77 = vector.shape_cast %76 : vector<1x8x64xf32> to vector<8x64xf32>
    %c2_59 = arith.constant 2 : index
    %c0_60 = arith.constant 0 : index
    %c0_61 = arith.constant 0 : index
    %78 = vector.load %arg4[%c2_59, %c0_60, %c0_61] : memref<3x64x64xbf16, #tpu.memory_space<vmem>>, vector<1x64x64xbf16>
    %79 = vector.shape_cast %78 : vector<1x64x64xbf16> to vector<64x64xbf16>
    %cst_62 = arith.constant dense<0.000000e+00> : vector<8x64xf32>
    %80 = tpu.matmul %49, %79, %cst_62 {dimension_numbers = #tpu.dot_dimension_numbers<[1], [0], [0], [1], [0, 0, 1, 1], [], []>} : vector<8x64xbf16>, vector<64x64xbf16>, vector<8x64xf32> -> vector<8x64xf32>
    %c0_63 = arith.constant 0 : index
    %c0_64 = arith.constant 0 : index
    %81 = vector.load %arg6[%c0_63, %c0_64] : memref<1x64xf32, #tpu.memory_space<vmem>>, vector<1x64xf32>
    %82 = vector.broadcast %81 : vector<1x64xf32> to vector<8x64xf32>
    %83 = arith.addf %80, %82 : vector<8x64xf32>
    %84 = arith.mulf %62, %83 : vector<8x64xf32>
    %85 = arith.addf %77, %84 : vector<8x64xf32>
    %86 = math.tanh %85 : vector<8x64xf32>
    %cst_65 = arith.constant 1.000000e+00 : f32
    %87 = vector.broadcast %cst_65 : f32 to vector<8x64xf32>
    %88 = arith.subf %87, %75 : vector<8x64xf32>
    %89 = arith.mulf %88, %86 : vector<8x64xf32>
    %90 = arith.mulf %75, %48 : vector<8x64xf32>
    %91 = arith.addf %89, %90 : vector<8x64xf32>
    %c0_i32 = arith.constant 0 : i32
    %c7_i32 = arith.constant 7 : i32
    %92 = vector.broadcast %c0_i32 : i32 to vector<8x64xi32>
    %93 = vector.broadcast %c7_i32 : i32 to vector<8x64xi32>
    %94 = arith.select %47, %92, %93 : vector<8x64xi1>, vector<8x64xi32>
    %95 = vector.broadcast %44 : vector<8x1xi32> to vector<8x64xi32>
    %96 = arith.cmpi sgt, %95, %94 : vector<8x64xi32>
    %97 = arith.select %96, %91, %48 : vector<8x64xi1>, vector<8x64xf32>
    %98 = arith.truncf %97 : vector<8x64xf32> to vector<8x64xbf16>
    %c0_66 = arith.constant 0 : index
    %c8 = arith.constant 8 : index
    %c0_67 = arith.constant 0 : index
    %99 = vector.load %arg10[%c0_66, %c8, %c0_67] : memref<3x64x64xf32, #tpu.memory_space<vmem>>, vector<1x8x64xf32>
    %100 = vector.shape_cast %99 : vector<1x8x64xf32> to vector<8x64xf32>
    %c0_68 = arith.constant 0 : index
    %c0_69 = arith.constant 0 : index
    %c0_70 = arith.constant 0 : index
    %101 = vector.load %arg4[%c0_68, %c0_69, %c0_70] : memref<3x64x64xbf16, #tpu.memory_space<vmem>>, vector<1x64x64xbf16>
    %102 = vector.shape_cast %101 : vector<1x64x64xbf16> to vector<64x64xbf16>
    %cst_71 = arith.constant dense<0.000000e+00> : vector<8x64xf32>
    %103 = tpu.matmul %98, %102, %cst_71 {dimension_numbers = #tpu.dot_dimension_numbers<[1], [0], [0], [1], [0, 0, 1, 1], [], []>} : vector<8x64xbf16>, vector<64x64xbf16>, vector<8x64xf32> -> vector<8x64xf32>
    %104 = arith.addf %100, %103 : vector<8x64xf32>
    %cst_72 = arith.constant 5.000000e-01 : f32
    %105 = vector.broadcast %cst_72 : f32 to vector<8x64xf32>
    %106 = arith.mulf %105, %104 : vector<8x64xf32>
    %107 = math.tanh %106 : vector<8x64xf32>
    %cst_73 = arith.constant 5.000000e-01 : f32
    %108 = vector.broadcast %cst_73 : f32 to vector<8x64xf32>
    %109 = arith.mulf %108, %107 : vector<8x64xf32>
    %cst_74 = arith.constant 5.000000e-01 : f32
    %110 = vector.broadcast %cst_74 : f32 to vector<8x64xf32>
    %111 = arith.addf %109, %110 : vector<8x64xf32>
    %c1_75 = arith.constant 1 : index
    %c8_76 = arith.constant 8 : index
    %c0_77 = arith.constant 0 : index
    %112 = vector.load %arg10[%c1_75, %c8_76, %c0_77] : memref<3x64x64xf32, #tpu.memory_space<vmem>>, vector<1x8x64xf32>
    %113 = vector.shape_cast %112 : vector<1x8x64xf32> to vector<8x64xf32>
    %c1_78 = arith.constant 1 : index
    %c0_79 = arith.constant 0 : index
    %c0_80 = arith.constant 0 : index
    %114 = vector.load %arg4[%c1_78, %c0_79, %c0_80] : memref<3x64x64xbf16, #tpu.memory_space<vmem>>, vector<1x64x64xbf16>
    %115 = vector.shape_cast %114 : vector<1x64x64xbf16> to vector<64x64xbf16>
    %cst_81 = arith.constant dense<0.000000e+00> : vector<8x64xf32>
    %116 = tpu.matmul %98, %115, %cst_81 {dimension_numbers = #tpu.dot_dimension_numbers<[1], [0], [0], [1], [0, 0, 1, 1], [], []>} : vector<8x64xbf16>, vector<64x64xbf16>, vector<8x64xf32> -> vector<8x64xf32>
    %117 = arith.addf %113, %116 : vector<8x64xf32>
    %cst_82 = arith.constant 5.000000e-01 : f32
    %118 = vector.broadcast %cst_82 : f32 to vector<8x64xf32>
    %119 = arith.mulf %118, %117 : vector<8x64xf32>
    %120 = math.tanh %119 : vector<8x64xf32>
    %cst_83 = arith.constant 5.000000e-01 : f32
    %121 = vector.broadcast %cst_83 : f32 to vector<8x64xf32>
    %122 = arith.mulf %121, %120 : vector<8x64xf32>
    %cst_84 = arith.constant 5.000000e-01 : f32
    %123 = vector.broadcast %cst_84 : f32 to vector<8x64xf32>
    %124 = arith.addf %122, %123 : vector<8x64xf32>
    %c2_85 = arith.constant 2 : index
    %c8_86 = arith.constant 8 : index
    %c0_87 = arith.constant 0 : index
    %125 = vector.load %arg10[%c2_85, %c8_86, %c0_87] : memref<3x64x64xf32, #tpu.memory_space<vmem>>, vector<1x8x64xf32>
    %126 = vector.shape_cast %125 : vector<1x8x64xf32> to vector<8x64xf32>
    %c2_88 = arith.constant 2 : index
    %c0_89 = arith.constant 0 : index
    %c0_90 = arith.constant 0 : index
    %127 = vector.load %arg4[%c2_88, %c0_89, %c0_90] : memref<3x64x64xbf16, #tpu.memory_space<vmem>>, vector<1x64x64xbf16>
    %128 = vector.shape_cast %127 : vector<1x64x64xbf16> to vector<64x64xbf16>
    %cst_91 = arith.constant dense<0.000000e+00> : vector<8x64xf32>
    %129 = tpu.matmul %98, %128, %cst_91 {dimension_numbers = #tpu.dot_dimension_numbers<[1], [0], [0], [1], [0, 0, 1, 1], [], []>} : vector<8x64xbf16>, vector<64x64xbf16>, vector<8x64xf32> -> vector<8x64xf32>
    %c0_92 = arith.constant 0 : index
    %c0_93 = arith.constant 0 : index
    %130 = vector.load %arg6[%c0_92, %c0_93] : memref<1x64xf32, #tpu.memory_space<vmem>>, vector<1x64xf32>
    %131 = vector.broadcast %130 : vector<1x64xf32> to vector<8x64xf32>
    %132 = arith.addf %129, %131 : vector<8x64xf32>
    %133 = arith.mulf %111, %132 : vector<8x64xf32>
    %134 = arith.addf %126, %133 : vector<8x64xf32>
    %135 = math.tanh %134 : vector<8x64xf32>
    %cst_94 = arith.constant 1.000000e+00 : f32
    %136 = vector.broadcast %cst_94 : f32 to vector<8x64xf32>
    %137 = arith.subf %136, %124 : vector<8x64xf32>
    %138 = arith.mulf %137, %135 : vector<8x64xf32>
    %139 = arith.mulf %124, %97 : vector<8x64xf32>
    %140 = arith.addf %138, %139 : vector<8x64xf32>
    %c1_i32 = arith.constant 1 : i32
    %c6_i32 = arith.constant 6 : i32
    %141 = vector.broadcast %c1_i32 : i32 to vector<8x64xi32>
    %142 = vector.broadcast %c6_i32 : i32 to vector<8x64xi32>
    %143 = arith.select %47, %141, %142 : vector<8x64xi1>, vector<8x64xi32>
    %144 = vector.broadcast %44 : vector<8x1xi32> to vector<8x64xi32>
    %145 = arith.cmpi sgt, %144, %143 : vector<8x64xi32>
    %146 = arith.select %145, %140, %97 : vector<8x64xi1>, vector<8x64xf32>
    %147 = arith.truncf %146 : vector<8x64xf32> to vector<8x64xbf16>
    %c0_95 = arith.constant 0 : index
    %c16 = arith.constant 16 : index
    %c0_96 = arith.constant 0 : index
    %148 = vector.load %arg10[%c0_95, %c16, %c0_96] : memref<3x64x64xf32, #tpu.memory_space<vmem>>, vector<1x8x64xf32>
    %149 = vector.shape_cast %148 : vector<1x8x64xf32> to vector<8x64xf32>
    %c0_97 = arith.constant 0 : index
    %c0_98 = arith.constant 0 : index
    %c0_99 = arith.constant 0 : index
    %150 = vector.load %arg4[%c0_97, %c0_98, %c0_99] : memref<3x64x64xbf16, #tpu.memory_space<vmem>>, vector<1x64x64xbf16>
    %151 = vector.shape_cast %150 : vector<1x64x64xbf16> to vector<64x64xbf16>
    %cst_100 = arith.constant dense<0.000000e+00> : vector<8x64xf32>
    %152 = tpu.matmul %147, %151, %cst_100 {dimension_numbers = #tpu.dot_dimension_numbers<[1], [0], [0], [1], [0, 0, 1, 1], [], []>} : vector<8x64xbf16>, vector<64x64xbf16>, vector<8x64xf32> -> vector<8x64xf32>
    %153 = arith.addf %149, %152 : vector<8x64xf32>
    %cst_101 = arith.constant 5.000000e-01 : f32
    %154 = vector.broadcast %cst_101 : f32 to vector<8x64xf32>
    %155 = arith.mulf %154, %153 : vector<8x64xf32>
    %156 = math.tanh %155 : vector<8x64xf32>
    %cst_102 = arith.constant 5.000000e-01 : f32
    %157 = vector.broadcast %cst_102 : f32 to vector<8x64xf32>
    %158 = arith.mulf %157, %156 : vector<8x64xf32>
    %cst_103 = arith.constant 5.000000e-01 : f32
    %159 = vector.broadcast %cst_103 : f32 to vector<8x64xf32>
    %160 = arith.addf %158, %159 : vector<8x64xf32>
    %c1_104 = arith.constant 1 : index
    %c16_105 = arith.constant 16 : index
    %c0_106 = arith.constant 0 : index
    %161 = vector.load %arg10[%c1_104, %c16_105, %c0_106] : memref<3x64x64xf32, #tpu.memory_space<vmem>>, vector<1x8x64xf32>
    %162 = vector.shape_cast %161 : vector<1x8x64xf32> to vector<8x64xf32>
    %c1_107 = arith.constant 1 : index
    %c0_108 = arith.constant 0 : index
    %c0_109 = arith.constant 0 : index
    %163 = vector.load %arg4[%c1_107, %c0_108, %c0_109] : memref<3x64x64xbf16, #tpu.memory_space<vmem>>, vector<1x64x64xbf16>
    %164 = vector.shape_cast %163 : vector<1x64x64xbf16> to vector<64x64xbf16>
    %cst_110 = arith.constant dense<0.000000e+00> : vector<8x64xf32>
    %165 = tpu.matmul %147, %164, %cst_110 {dimension_numbers = #tpu.dot_dimension_numbers<[1], [0], [0], [1], [0, 0, 1, 1], [], []>} : vector<8x64xbf16>, vector<64x64xbf16>, vector<8x64xf32> -> vector<8x64xf32>
    %166 = arith.addf %162, %165 : vector<8x64xf32>
    %cst_111 = arith.constant 5.000000e-01 : f32
    %167 = vector.broadcast %cst_111 : f32 to vector<8x64xf32>
    %168 = arith.mulf %167, %166 : vector<8x64xf32>
    %169 = math.tanh %168 : vector<8x64xf32>
    %cst_112 = arith.constant 5.000000e-01 : f32
    %170 = vector.broadcast %cst_112 : f32 to vector<8x64xf32>
    %171 = arith.mulf %170, %169 : vector<8x64xf32>
    %cst_113 = arith.constant 5.000000e-01 : f32
    %172 = vector.broadcast %cst_113 : f32 to vector<8x64xf32>
    %173 = arith.addf %171, %172 : vector<8x64xf32>
    %c2_114 = arith.constant 2 : index
    %c16_115 = arith.constant 16 : index
    %c0_116 = arith.constant 0 : index
    %174 = vector.load %arg10[%c2_114, %c16_115, %c0_116] : memref<3x64x64xf32, #tpu.memory_space<vmem>>, vector<1x8x64xf32>
    %175 = vector.shape_cast %174 : vector<1x8x64xf32> to vector<8x64xf32>
    %c2_117 = arith.constant 2 : index
    %c0_118 = arith.constant 0 : index
    %c0_119 = arith.constant 0 : index
    %176 = vector.load %arg4[%c2_117, %c0_118, %c0_119] : memref<3x64x64xbf16, #tpu.memory_space<vmem>>, vector<1x64x64xbf16>
    %177 = vector.shape_cast %176 : vector<1x64x64xbf16> to vector<64x64xbf16>
    %cst_120 = arith.constant dense<0.000000e+00> : vector<8x64xf32>
    %178 = tpu.matmul %147, %177, %cst_120 {dimension_numbers = #tpu.dot_dimension_numbers<[1], [0], [0], [1], [0, 0, 1, 1], [], []>} : vector<8x64xbf16>, vector<64x64xbf16>, vector<8x64xf32> -> vector<8x64xf32>
    %c0_121 = arith.constant 0 : index
    %c0_122 = arith.constant 0 : index
    %179 = vector.load %arg6[%c0_121, %c0_122] : memref<1x64xf32, #tpu.memory_space<vmem>>, vector<1x64xf32>
    %180 = vector.broadcast %179 : vector<1x64xf32> to vector<8x64xf32>
    %181 = arith.addf %178, %180 : vector<8x64xf32>
    %182 = arith.mulf %160, %181 : vector<8x64xf32>
    %183 = arith.addf %175, %182 : vector<8x64xf32>
    %184 = math.tanh %183 : vector<8x64xf32>
    %cst_123 = arith.constant 1.000000e+00 : f32
    %185 = vector.broadcast %cst_123 : f32 to vector<8x64xf32>
    %186 = arith.subf %185, %173 : vector<8x64xf32>
    %187 = arith.mulf %186, %184 : vector<8x64xf32>
    %188 = arith.mulf %173, %146 : vector<8x64xf32>
    %189 = arith.addf %187, %188 : vector<8x64xf32>
    %c2_i32 = arith.constant 2 : i32
    %c5_i32 = arith.constant 5 : i32
    %190 = vector.broadcast %c2_i32 : i32 to vector<8x64xi32>
    %191 = vector.broadcast %c5_i32 : i32 to vector<8x64xi32>
    %192 = arith.select %47, %190, %191 : vector<8x64xi1>, vector<8x64xi32>
    %193 = vector.broadcast %44 : vector<8x1xi32> to vector<8x64xi32>
    %194 = arith.cmpi sgt, %193, %192 : vector<8x64xi32>
    %195 = arith.select %194, %189, %146 : vector<8x64xi1>, vector<8x64xf32>
    %196 = arith.truncf %195 : vector<8x64xf32> to vector<8x64xbf16>
    %c0_124 = arith.constant 0 : index
    %c24 = arith.constant 24 : index
    %c0_125 = arith.constant 0 : index
    %197 = vector.load %arg10[%c0_124, %c24, %c0_125] : memref<3x64x64xf32, #tpu.memory_space<vmem>>, vector<1x8x64xf32>
    %198 = vector.shape_cast %197 : vector<1x8x64xf32> to vector<8x64xf32>
    %c0_126 = arith.constant 0 : index
    %c0_127 = arith.constant 0 : index
    %c0_128 = arith.constant 0 : index
    %199 = vector.load %arg4[%c0_126, %c0_127, %c0_128] : memref<3x64x64xbf16, #tpu.memory_space<vmem>>, vector<1x64x64xbf16>
    %200 = vector.shape_cast %199 : vector<1x64x64xbf16> to vector<64x64xbf16>
    %cst_129 = arith.constant dense<0.000000e+00> : vector<8x64xf32>
    %201 = tpu.matmul %196, %200, %cst_129 {dimension_numbers = #tpu.dot_dimension_numbers<[1], [0], [0], [1], [0, 0, 1, 1], [], []>} : vector<8x64xbf16>, vector<64x64xbf16>, vector<8x64xf32> -> vector<8x64xf32>
    %202 = arith.addf %198, %201 : vector<8x64xf32>
    %cst_130 = arith.constant 5.000000e-01 : f32
    %203 = vector.broadcast %cst_130 : f32 to vector<8x64xf32>
    %204 = arith.mulf %203, %202 : vector<8x64xf32>
    %205 = math.tanh %204 : vector<8x64xf32>
    %cst_131 = arith.constant 5.000000e-01 : f32
    %206 = vector.broadcast %cst_131 : f32 to vector<8x64xf32>
    %207 = arith.mulf %206, %205 : vector<8x64xf32>
    %cst_132 = arith.constant 5.000000e-01 : f32
    %208 = vector.broadcast %cst_132 : f32 to vector<8x64xf32>
    %209 = arith.addf %207, %208 : vector<8x64xf32>
    %c1_133 = arith.constant 1 : index
    %c24_134 = arith.constant 24 : index
    %c0_135 = arith.constant 0 : index
    %210 = vector.load %arg10[%c1_133, %c24_134, %c0_135] : memref<3x64x64xf32, #tpu.memory_space<vmem>>, vector<1x8x64xf32>
    %211 = vector.shape_cast %210 : vector<1x8x64xf32> to vector<8x64xf32>
    %c1_136 = arith.constant 1 : index
    %c0_137 = arith.constant 0 : index
    %c0_138 = arith.constant 0 : index
    %212 = vector.load %arg4[%c1_136, %c0_137, %c0_138] : memref<3x64x64xbf16, #tpu.memory_space<vmem>>, vector<1x64x64xbf16>
    %213 = vector.shape_cast %212 : vector<1x64x64xbf16> to vector<64x64xbf16>
    %cst_139 = arith.constant dense<0.000000e+00> : vector<8x64xf32>
    %214 = tpu.matmul %196, %213, %cst_139 {dimension_numbers = #tpu.dot_dimension_numbers<[1], [0], [0], [1], [0, 0, 1, 1], [], []>} : vector<8x64xbf16>, vector<64x64xbf16>, vector<8x64xf32> -> vector<8x64xf32>
    %215 = arith.addf %211, %214 : vector<8x64xf32>
    %cst_140 = arith.constant 5.000000e-01 : f32
    %216 = vector.broadcast %cst_140 : f32 to vector<8x64xf32>
    %217 = arith.mulf %216, %215 : vector<8x64xf32>
    %218 = math.tanh %217 : vector<8x64xf32>
    %cst_141 = arith.constant 5.000000e-01 : f32
    %219 = vector.broadcast %cst_141 : f32 to vector<8x64xf32>
    %220 = arith.mulf %219, %218 : vector<8x64xf32>
    %cst_142 = arith.constant 5.000000e-01 : f32
    %221 = vector.broadcast %cst_142 : f32 to vector<8x64xf32>
    %222 = arith.addf %220, %221 : vector<8x64xf32>
    %c2_143 = arith.constant 2 : index
    %c24_144 = arith.constant 24 : index
    %c0_145 = arith.constant 0 : index
    %223 = vector.load %arg10[%c2_143, %c24_144, %c0_145] : memref<3x64x64xf32, #tpu.memory_space<vmem>>, vector<1x8x64xf32>
    %224 = vector.shape_cast %223 : vector<1x8x64xf32> to vector<8x64xf32>
    %c2_146 = arith.constant 2 : index
    %c0_147 = arith.constant 0 : index
    %c0_148 = arith.constant 0 : index
    %225 = vector.load %arg4[%c2_146, %c0_147, %c0_148] : memref<3x64x64xbf16, #tpu.memory_space<vmem>>, vector<1x64x64xbf16>
    %226 = vector.shape_cast %225 : vector<1x64x64xbf16> to vector<64x64xbf16>
    %cst_149 = arith.constant dense<0.000000e+00> : vector<8x64xf32>
    %227 = tpu.matmul %196, %226, %cst_149 {dimension_numbers = #tpu.dot_dimension_numbers<[1], [0], [0], [1], [0, 0, 1, 1], [], []>} : vector<8x64xbf16>, vector<64x64xbf16>, vector<8x64xf32> -> vector<8x64xf32>
    %c0_150 = arith.constant 0 : index
    %c0_151 = arith.constant 0 : index
    %228 = vector.load %arg6[%c0_150, %c0_151] : memref<1x64xf32, #tpu.memory_space<vmem>>, vector<1x64xf32>
    %229 = vector.broadcast %228 : vector<1x64xf32> to vector<8x64xf32>
    %230 = arith.addf %227, %229 : vector<8x64xf32>
    %231 = arith.mulf %209, %230 : vector<8x64xf32>
    %232 = arith.addf %224, %231 : vector<8x64xf32>
    %233 = math.tanh %232 : vector<8x64xf32>
    %cst_152 = arith.constant 1.000000e+00 : f32
    %234 = vector.broadcast %cst_152 : f32 to vector<8x64xf32>
    %235 = arith.subf %234, %222 : vector<8x64xf32>
    %236 = arith.mulf %235, %233 : vector<8x64xf32>
    %237 = arith.mulf %222, %195 : vector<8x64xf32>
    %238 = arith.addf %236, %237 : vector<8x64xf32>
    %c3_i32 = arith.constant 3 : i32
    %c4_i32 = arith.constant 4 : i32
    %239 = vector.broadcast %c3_i32 : i32 to vector<8x64xi32>
    %240 = vector.broadcast %c4_i32 : i32 to vector<8x64xi32>
    %241 = arith.select %47, %239, %240 : vector<8x64xi1>, vector<8x64xi32>
    %242 = vector.broadcast %44 : vector<8x1xi32> to vector<8x64xi32>
    %243 = arith.cmpi sgt, %242, %241 : vector<8x64xi32>
    %244 = arith.select %243, %238, %195 : vector<8x64xi1>, vector<8x64xf32>
    %245 = arith.truncf %244 : vector<8x64xf32> to vector<8x64xbf16>
    %c0_153 = arith.constant 0 : index
    %c32 = arith.constant 32 : index
    %c0_154 = arith.constant 0 : index
    %246 = vector.load %arg10[%c0_153, %c32, %c0_154] : memref<3x64x64xf32, #tpu.memory_space<vmem>>, vector<1x8x64xf32>
    %247 = vector.shape_cast %246 : vector<1x8x64xf32> to vector<8x64xf32>
    %c0_155 = arith.constant 0 : index
    %c0_156 = arith.constant 0 : index
    %c0_157 = arith.constant 0 : index
    %248 = vector.load %arg4[%c0_155, %c0_156, %c0_157] : memref<3x64x64xbf16, #tpu.memory_space<vmem>>, vector<1x64x64xbf16>
    %249 = vector.shape_cast %248 : vector<1x64x64xbf16> to vector<64x64xbf16>
    %cst_158 = arith.constant dense<0.000000e+00> : vector<8x64xf32>
    %250 = tpu.matmul %245, %249, %cst_158 {dimension_numbers = #tpu.dot_dimension_numbers<[1], [0], [0], [1], [0, 0, 1, 1], [], []>} : vector<8x64xbf16>, vector<64x64xbf16>, vector<8x64xf32> -> vector<8x64xf32>
    %251 = arith.addf %247, %250 : vector<8x64xf32>
    %cst_159 = arith.constant 5.000000e-01 : f32
    %252 = vector.broadcast %cst_159 : f32 to vector<8x64xf32>
    %253 = arith.mulf %252, %251 : vector<8x64xf32>
    %254 = math.tanh %253 : vector<8x64xf32>
    %cst_160 = arith.constant 5.000000e-01 : f32
    %255 = vector.broadcast %cst_160 : f32 to vector<8x64xf32>
    %256 = arith.mulf %255, %254 : vector<8x64xf32>
    %cst_161 = arith.constant 5.000000e-01 : f32
    %257 = vector.broadcast %cst_161 : f32 to vector<8x64xf32>
    %258 = arith.addf %256, %257 : vector<8x64xf32>
    %c1_162 = arith.constant 1 : index
    %c32_163 = arith.constant 32 : index
    %c0_164 = arith.constant 0 : index
    %259 = vector.load %arg10[%c1_162, %c32_163, %c0_164] : memref<3x64x64xf32, #tpu.memory_space<vmem>>, vector<1x8x64xf32>
    %260 = vector.shape_cast %259 : vector<1x8x64xf32> to vector<8x64xf32>
    %c1_165 = arith.constant 1 : index
    %c0_166 = arith.constant 0 : index
    %c0_167 = arith.constant 0 : index
    %261 = vector.load %arg4[%c1_165, %c0_166, %c0_167] : memref<3x64x64xbf16, #tpu.memory_space<vmem>>, vector<1x64x64xbf16>
    %262 = vector.shape_cast %261 : vector<1x64x64xbf16> to vector<64x64xbf16>
    %cst_168 = arith.constant dense<0.000000e+00> : vector<8x64xf32>
    %263 = tpu.matmul %245, %262, %cst_168 {dimension_numbers = #tpu.dot_dimension_numbers<[1], [0], [0], [1], [0, 0, 1, 1], [], []>} : vector<8x64xbf16>, vector<64x64xbf16>, vector<8x64xf32> -> vector<8x64xf32>
    %264 = arith.addf %260, %263 : vector<8x64xf32>
    %cst_169 = arith.constant 5.000000e-01 : f32
    %265 = vector.broadcast %cst_169 : f32 to vector<8x64xf32>
    %266 = arith.mulf %265, %264 : vector<8x64xf32>
    %267 = math.tanh %266 : vector<8x64xf32>
    %cst_170 = arith.constant 5.000000e-01 : f32
    %268 = vector.broadcast %cst_170 : f32 to vector<8x64xf32>
    %269 = arith.mulf %268, %267 : vector<8x64xf32>
    %cst_171 = arith.constant 5.000000e-01 : f32
    %270 = vector.broadcast %cst_171 : f32 to vector<8x64xf32>
    %271 = arith.addf %269, %270 : vector<8x64xf32>
    %c2_172 = arith.constant 2 : index
    %c32_173 = arith.constant 32 : index
    %c0_174 = arith.constant 0 : index
    %272 = vector.load %arg10[%c2_172, %c32_173, %c0_174] : memref<3x64x64xf32, #tpu.memory_space<vmem>>, vector<1x8x64xf32>
    %273 = vector.shape_cast %272 : vector<1x8x64xf32> to vector<8x64xf32>
    %c2_175 = arith.constant 2 : index
    %c0_176 = arith.constant 0 : index
    %c0_177 = arith.constant 0 : index
    %274 = vector.load %arg4[%c2_175, %c0_176, %c0_177] : memref<3x64x64xbf16, #tpu.memory_space<vmem>>, vector<1x64x64xbf16>
    %275 = vector.shape_cast %274 : vector<1x64x64xbf16> to vector<64x64xbf16>
    %cst_178 = arith.constant dense<0.000000e+00> : vector<8x64xf32>
    %276 = tpu.matmul %245, %275, %cst_178 {dimension_numbers = #tpu.dot_dimension_numbers<[1], [0], [0], [1], [0, 0, 1, 1], [], []>} : vector<8x64xbf16>, vector<64x64xbf16>, vector<8x64xf32> -> vector<8x64xf32>
    %c0_179 = arith.constant 0 : index
    %c0_180 = arith.constant 0 : index
    %277 = vector.load %arg6[%c0_179, %c0_180] : memref<1x64xf32, #tpu.memory_space<vmem>>, vector<1x64xf32>
    %278 = vector.broadcast %277 : vector<1x64xf32> to vector<8x64xf32>
    %279 = arith.addf %276, %278 : vector<8x64xf32>
    %280 = arith.mulf %258, %279 : vector<8x64xf32>
    %281 = arith.addf %273, %280 : vector<8x64xf32>
    %282 = math.tanh %281 : vector<8x64xf32>
    %cst_181 = arith.constant 1.000000e+00 : f32
    %283 = vector.broadcast %cst_181 : f32 to vector<8x64xf32>
    %284 = arith.subf %283, %271 : vector<8x64xf32>
    %285 = arith.mulf %284, %282 : vector<8x64xf32>
    %286 = arith.mulf %271, %244 : vector<8x64xf32>
    %287 = arith.addf %285, %286 : vector<8x64xf32>
    %c4_i32_182 = arith.constant 4 : i32
    %c3_i32_183 = arith.constant 3 : i32
    %288 = vector.broadcast %c4_i32_182 : i32 to vector<8x64xi32>
    %289 = vector.broadcast %c3_i32_183 : i32 to vector<8x64xi32>
    %290 = arith.select %47, %288, %289 : vector<8x64xi1>, vector<8x64xi32>
    %291 = vector.broadcast %44 : vector<8x1xi32> to vector<8x64xi32>
    %292 = arith.cmpi sgt, %291, %290 : vector<8x64xi32>
    %293 = arith.select %292, %287, %244 : vector<8x64xi1>, vector<8x64xf32>
    %294 = arith.truncf %293 : vector<8x64xf32> to vector<8x64xbf16>
    %c0_184 = arith.constant 0 : index
    %c40 = arith.constant 40 : index
    %c0_185 = arith.constant 0 : index
    %295 = vector.load %arg10[%c0_184, %c40, %c0_185] : memref<3x64x64xf32, #tpu.memory_space<vmem>>, vector<1x8x64xf32>
    %296 = vector.shape_cast %295 : vector<1x8x64xf32> to vector<8x64xf32>
    %c0_186 = arith.constant 0 : index
    %c0_187 = arith.constant 0 : index
    %c0_188 = arith.constant 0 : index
    %297 = vector.load %arg4[%c0_186, %c0_187, %c0_188] : memref<3x64x64xbf16, #tpu.memory_space<vmem>>, vector<1x64x64xbf16>
    %298 = vector.shape_cast %297 : vector<1x64x64xbf16> to vector<64x64xbf16>
    %cst_189 = arith.constant dense<0.000000e+00> : vector<8x64xf32>
    %299 = tpu.matmul %294, %298, %cst_189 {dimension_numbers = #tpu.dot_dimension_numbers<[1], [0], [0], [1], [0, 0, 1, 1], [], []>} : vector<8x64xbf16>, vector<64x64xbf16>, vector<8x64xf32> -> vector<8x64xf32>
    %300 = arith.addf %296, %299 : vector<8x64xf32>
    %cst_190 = arith.constant 5.000000e-01 : f32
    %301 = vector.broadcast %cst_190 : f32 to vector<8x64xf32>
    %302 = arith.mulf %301, %300 : vector<8x64xf32>
    %303 = math.tanh %302 : vector<8x64xf32>
    %cst_191 = arith.constant 5.000000e-01 : f32
    %304 = vector.broadcast %cst_191 : f32 to vector<8x64xf32>
    %305 = arith.mulf %304, %303 : vector<8x64xf32>
    %cst_192 = arith.constant 5.000000e-01 : f32
    %306 = vector.broadcast %cst_192 : f32 to vector<8x64xf32>
    %307 = arith.addf %305, %306 : vector<8x64xf32>
    %c1_193 = arith.constant 1 : index
    %c40_194 = arith.constant 40 : index
    %c0_195 = arith.constant 0 : index
    %308 = vector.load %arg10[%c1_193, %c40_194, %c0_195] : memref<3x64x64xf32, #tpu.memory_space<vmem>>, vector<1x8x64xf32>
    %309 = vector.shape_cast %308 : vector<1x8x64xf32> to vector<8x64xf32>
    %c1_196 = arith.constant 1 : index
    %c0_197 = arith.constant 0 : index
    %c0_198 = arith.constant 0 : index
    %310 = vector.load %arg4[%c1_196, %c0_197, %c0_198] : memref<3x64x64xbf16, #tpu.memory_space<vmem>>, vector<1x64x64xbf16>
    %311 = vector.shape_cast %310 : vector<1x64x64xbf16> to vector<64x64xbf16>
    %cst_199 = arith.constant dense<0.000000e+00> : vector<8x64xf32>
    %312 = tpu.matmul %294, %311, %cst_199 {dimension_numbers = #tpu.dot_dimension_numbers<[1], [0], [0], [1], [0, 0, 1, 1], [], []>} : vector<8x64xbf16>, vector<64x64xbf16>, vector<8x64xf32> -> vector<8x64xf32>
    %313 = arith.addf %309, %312 : vector<8x64xf32>
    %cst_200 = arith.constant 5.000000e-01 : f32
    %314 = vector.broadcast %cst_200 : f32 to vector<8x64xf32>
    %315 = arith.mulf %314, %313 : vector<8x64xf32>
    %316 = math.tanh %315 : vector<8x64xf32>
    %cst_201 = arith.constant 5.000000e-01 : f32
    %317 = vector.broadcast %cst_201 : f32 to vector<8x64xf32>
    %318 = arith.mulf %317, %316 : vector<8x64xf32>
    %cst_202 = arith.constant 5.000000e-01 : f32
    %319 = vector.broadcast %cst_202 : f32 to vector<8x64xf32>
    %320 = arith.addf %318, %319 : vector<8x64xf32>
    %c2_203 = arith.constant 2 : index
    %c40_204 = arith.constant 40 : index
    %c0_205 = arith.constant 0 : index
    %321 = vector.load %arg10[%c2_203, %c40_204, %c0_205] : memref<3x64x64xf32, #tpu.memory_space<vmem>>, vector<1x8x64xf32>
    %322 = vector.shape_cast %321 : vector<1x8x64xf32> to vector<8x64xf32>
    %c2_206 = arith.constant 2 : index
    %c0_207 = arith.constant 0 : index
    %c0_208 = arith.constant 0 : index
    %323 = vector.load %arg4[%c2_206, %c0_207, %c0_208] : memref<3x64x64xbf16, #tpu.memory_space<vmem>>, vector<1x64x64xbf16>
    %324 = vector.shape_cast %323 : vector<1x64x64xbf16> to vector<64x64xbf16>
    %cst_209 = arith.constant dense<0.000000e+00> : vector<8x64xf32>
    %325 = tpu.matmul %294, %324, %cst_209 {dimension_numbers = #tpu.dot_dimension_numbers<[1], [0], [0], [1], [0, 0, 1, 1], [], []>} : vector<8x64xbf16>, vector<64x64xbf16>, vector<8x64xf32> -> vector<8x64xf32>
    %c0_210 = arith.constant 0 : index
    %c0_211 = arith.constant 0 : index
    %326 = vector.load %arg6[%c0_210, %c0_211] : memref<1x64xf32, #tpu.memory_space<vmem>>, vector<1x64xf32>
    %327 = vector.broadcast %326 : vector<1x64xf32> to vector<8x64xf32>
    %328 = arith.addf %325, %327 : vector<8x64xf32>
    %329 = arith.mulf %307, %328 : vector<8x64xf32>
    %330 = arith.addf %322, %329 : vector<8x64xf32>
    %331 = math.tanh %330 : vector<8x64xf32>
    %cst_212 = arith.constant 1.000000e+00 : f32
    %332 = vector.broadcast %cst_212 : f32 to vector<8x64xf32>
    %333 = arith.subf %332, %320 : vector<8x64xf32>
    %334 = arith.mulf %333, %331 : vector<8x64xf32>
    %335 = arith.mulf %320, %293 : vector<8x64xf32>
    %336 = arith.addf %334, %335 : vector<8x64xf32>
    %c5_i32_213 = arith.constant 5 : i32
    %c2_i32_214 = arith.constant 2 : i32
    %337 = vector.broadcast %c5_i32_213 : i32 to vector<8x64xi32>
    %338 = vector.broadcast %c2_i32_214 : i32 to vector<8x64xi32>
    %339 = arith.select %47, %337, %338 : vector<8x64xi1>, vector<8x64xi32>
    %340 = vector.broadcast %44 : vector<8x1xi32> to vector<8x64xi32>
    %341 = arith.cmpi sgt, %340, %339 : vector<8x64xi32>
    %342 = arith.select %341, %336, %293 : vector<8x64xi1>, vector<8x64xf32>
    %343 = arith.truncf %342 : vector<8x64xf32> to vector<8x64xbf16>
    %c0_215 = arith.constant 0 : index
    %c48 = arith.constant 48 : index
    %c0_216 = arith.constant 0 : index
    %344 = vector.load %arg10[%c0_215, %c48, %c0_216] : memref<3x64x64xf32, #tpu.memory_space<vmem>>, vector<1x8x64xf32>
    %345 = vector.shape_cast %344 : vector<1x8x64xf32> to vector<8x64xf32>
    %c0_217 = arith.constant 0 : index
    %c0_218 = arith.constant 0 : index
    %c0_219 = arith.constant 0 : index
    %346 = vector.load %arg4[%c0_217, %c0_218, %c0_219] : memref<3x64x64xbf16, #tpu.memory_space<vmem>>, vector<1x64x64xbf16>
    %347 = vector.shape_cast %346 : vector<1x64x64xbf16> to vector<64x64xbf16>
    %cst_220 = arith.constant dense<0.000000e+00> : vector<8x64xf32>
    %348 = tpu.matmul %343, %347, %cst_220 {dimension_numbers = #tpu.dot_dimension_numbers<[1], [0], [0], [1], [0, 0, 1, 1], [], []>} : vector<8x64xbf16>, vector<64x64xbf16>, vector<8x64xf32> -> vector<8x64xf32>
    %349 = arith.addf %345, %348 : vector<8x64xf32>
    %cst_221 = arith.constant 5.000000e-01 : f32
    %350 = vector.broadcast %cst_221 : f32 to vector<8x64xf32>
    %351 = arith.mulf %350, %349 : vector<8x64xf32>
    %352 = math.tanh %351 : vector<8x64xf32>
    %cst_222 = arith.constant 5.000000e-01 : f32
    %353 = vector.broadcast %cst_222 : f32 to vector<8x64xf32>
    %354 = arith.mulf %353, %352 : vector<8x64xf32>
    %cst_223 = arith.constant 5.000000e-01 : f32
    %355 = vector.broadcast %cst_223 : f32 to vector<8x64xf32>
    %356 = arith.addf %354, %355 : vector<8x64xf32>
    %c1_224 = arith.constant 1 : index
    %c48_225 = arith.constant 48 : index
    %c0_226 = arith.constant 0 : index
    %357 = vector.load %arg10[%c1_224, %c48_225, %c0_226] : memref<3x64x64xf32, #tpu.memory_space<vmem>>, vector<1x8x64xf32>
    %358 = vector.shape_cast %357 : vector<1x8x64xf32> to vector<8x64xf32>
    %c1_227 = arith.constant 1 : index
    %c0_228 = arith.constant 0 : index
    %c0_229 = arith.constant 0 : index
    %359 = vector.load %arg4[%c1_227, %c0_228, %c0_229] : memref<3x64x64xbf16, #tpu.memory_space<vmem>>, vector<1x64x64xbf16>
    %360 = vector.shape_cast %359 : vector<1x64x64xbf16> to vector<64x64xbf16>
    %cst_230 = arith.constant dense<0.000000e+00> : vector<8x64xf32>
    %361 = tpu.matmul %343, %360, %cst_230 {dimension_numbers = #tpu.dot_dimension_numbers<[1], [0], [0], [1], [0, 0, 1, 1], [], []>} : vector<8x64xbf16>, vector<64x64xbf16>, vector<8x64xf32> -> vector<8x64xf32>
    %362 = arith.addf %358, %361 : vector<8x64xf32>
    %cst_231 = arith.constant 5.000000e-01 : f32
    %363 = vector.broadcast %cst_231 : f32 to vector<8x64xf32>
    %364 = arith.mulf %363, %362 : vector<8x64xf32>
    %365 = math.tanh %364 : vector<8x64xf32>
    %cst_232 = arith.constant 5.000000e-01 : f32
    %366 = vector.broadcast %cst_232 : f32 to vector<8x64xf32>
    %367 = arith.mulf %366, %365 : vector<8x64xf32>
    %cst_233 = arith.constant 5.000000e-01 : f32
    %368 = vector.broadcast %cst_233 : f32 to vector<8x64xf32>
    %369 = arith.addf %367, %368 : vector<8x64xf32>
    %c2_234 = arith.constant 2 : index
    %c48_235 = arith.constant 48 : index
    %c0_236 = arith.constant 0 : index
    %370 = vector.load %arg10[%c2_234, %c48_235, %c0_236] : memref<3x64x64xf32, #tpu.memory_space<vmem>>, vector<1x8x64xf32>
    %371 = vector.shape_cast %370 : vector<1x8x64xf32> to vector<8x64xf32>
    %c2_237 = arith.constant 2 : index
    %c0_238 = arith.constant 0 : index
    %c0_239 = arith.constant 0 : index
    %372 = vector.load %arg4[%c2_237, %c0_238, %c0_239] : memref<3x64x64xbf16, #tpu.memory_space<vmem>>, vector<1x64x64xbf16>
    %373 = vector.shape_cast %372 : vector<1x64x64xbf16> to vector<64x64xbf16>
    %cst_240 = arith.constant dense<0.000000e+00> : vector<8x64xf32>
    %374 = tpu.matmul %343, %373, %cst_240 {dimension_numbers = #tpu.dot_dimension_numbers<[1], [0], [0], [1], [0, 0, 1, 1], [], []>} : vector<8x64xbf16>, vector<64x64xbf16>, vector<8x64xf32> -> vector<8x64xf32>
    %c0_241 = arith.constant 0 : index
    %c0_242 = arith.constant 0 : index
    %375 = vector.load %arg6[%c0_241, %c0_242] : memref<1x64xf32, #tpu.memory_space<vmem>>, vector<1x64xf32>
    %376 = vector.broadcast %375 : vector<1x64xf32> to vector<8x64xf32>
    %377 = arith.addf %374, %376 : vector<8x64xf32>
    %378 = arith.mulf %356, %377 : vector<8x64xf32>
    %379 = arith.addf %371, %378 : vector<8x64xf32>
    %380 = math.tanh %379 : vector<8x64xf32>
    %cst_243 = arith.constant 1.000000e+00 : f32
    %381 = vector.broadcast %cst_243 : f32 to vector<8x64xf32>
    %382 = arith.subf %381, %369 : vector<8x64xf32>
    %383 = arith.mulf %382, %380 : vector<8x64xf32>
    %384 = arith.mulf %369, %342 : vector<8x64xf32>
    %385 = arith.addf %383, %384 : vector<8x64xf32>
    %c6_i32_244 = arith.constant 6 : i32
    %c1_i32_245 = arith.constant 1 : i32
    %386 = vector.broadcast %c6_i32_244 : i32 to vector<8x64xi32>
    %387 = vector.broadcast %c1_i32_245 : i32 to vector<8x64xi32>
    %388 = arith.select %47, %386, %387 : vector<8x64xi1>, vector<8x64xi32>
    %389 = vector.broadcast %44 : vector<8x1xi32> to vector<8x64xi32>
    %390 = arith.cmpi sgt, %389, %388 : vector<8x64xi32>
    %391 = arith.select %390, %385, %342 : vector<8x64xi1>, vector<8x64xf32>
    %392 = arith.truncf %391 : vector<8x64xf32> to vector<8x64xbf16>
    %c0_246 = arith.constant 0 : index
    %c56 = arith.constant 56 : index
    %c0_247 = arith.constant 0 : index
    %393 = vector.load %arg10[%c0_246, %c56, %c0_247] : memref<3x64x64xf32, #tpu.memory_space<vmem>>, vector<1x8x64xf32>
    %394 = vector.shape_cast %393 : vector<1x8x64xf32> to vector<8x64xf32>
    %c0_248 = arith.constant 0 : index
    %c0_249 = arith.constant 0 : index
    %c0_250 = arith.constant 0 : index
    %395 = vector.load %arg4[%c0_248, %c0_249, %c0_250] : memref<3x64x64xbf16, #tpu.memory_space<vmem>>, vector<1x64x64xbf16>
    %396 = vector.shape_cast %395 : vector<1x64x64xbf16> to vector<64x64xbf16>
    %cst_251 = arith.constant dense<0.000000e+00> : vector<8x64xf32>
    %397 = tpu.matmul %392, %396, %cst_251 {dimension_numbers = #tpu.dot_dimension_numbers<[1], [0], [0], [1], [0, 0, 1, 1], [], []>} : vector<8x64xbf16>, vector<64x64xbf16>, vector<8x64xf32> -> vector<8x64xf32>
    %398 = arith.addf %394, %397 : vector<8x64xf32>
    %cst_252 = arith.constant 5.000000e-01 : f32
    %399 = vector.broadcast %cst_252 : f32 to vector<8x64xf32>
    %400 = arith.mulf %399, %398 : vector<8x64xf32>
    %401 = math.tanh %400 : vector<8x64xf32>
    %cst_253 = arith.constant 5.000000e-01 : f32
    %402 = vector.broadcast %cst_253 : f32 to vector<8x64xf32>
    %403 = arith.mulf %402, %401 : vector<8x64xf32>
    %cst_254 = arith.constant 5.000000e-01 : f32
    %404 = vector.broadcast %cst_254 : f32 to vector<8x64xf32>
    %405 = arith.addf %403, %404 : vector<8x64xf32>
    %c1_255 = arith.constant 1 : index
    %c56_256 = arith.constant 56 : index
    %c0_257 = arith.constant 0 : index
    %406 = vector.load %arg10[%c1_255, %c56_256, %c0_257] : memref<3x64x64xf32, #tpu.memory_space<vmem>>, vector<1x8x64xf32>
    %407 = vector.shape_cast %406 : vector<1x8x64xf32> to vector<8x64xf32>
    %c1_258 = arith.constant 1 : index
    %c0_259 = arith.constant 0 : index
    %c0_260 = arith.constant 0 : index
    %408 = vector.load %arg4[%c1_258, %c0_259, %c0_260] : memref<3x64x64xbf16, #tpu.memory_space<vmem>>, vector<1x64x64xbf16>
    %409 = vector.shape_cast %408 : vector<1x64x64xbf16> to vector<64x64xbf16>
    %cst_261 = arith.constant dense<0.000000e+00> : vector<8x64xf32>
    %410 = tpu.matmul %392, %409, %cst_261 {dimension_numbers = #tpu.dot_dimension_numbers<[1], [0], [0], [1], [0, 0, 1, 1], [], []>} : vector<8x64xbf16>, vector<64x64xbf16>, vector<8x64xf32> -> vector<8x64xf32>
    %411 = arith.addf %407, %410 : vector<8x64xf32>
    %cst_262 = arith.constant 5.000000e-01 : f32
    %412 = vector.broadcast %cst_262 : f32 to vector<8x64xf32>
    %413 = arith.mulf %412, %411 : vector<8x64xf32>
    %414 = math.tanh %413 : vector<8x64xf32>
    %cst_263 = arith.constant 5.000000e-01 : f32
    %415 = vector.broadcast %cst_263 : f32 to vector<8x64xf32>
    %416 = arith.mulf %415, %414 : vector<8x64xf32>
    %cst_264 = arith.constant 5.000000e-01 : f32
    %417 = vector.broadcast %cst_264 : f32 to vector<8x64xf32>
    %418 = arith.addf %416, %417 : vector<8x64xf32>
    %c2_265 = arith.constant 2 : index
    %c56_266 = arith.constant 56 : index
    %c0_267 = arith.constant 0 : index
    %419 = vector.load %arg10[%c2_265, %c56_266, %c0_267] : memref<3x64x64xf32, #tpu.memory_space<vmem>>, vector<1x8x64xf32>
    %420 = vector.shape_cast %419 : vector<1x8x64xf32> to vector<8x64xf32>
    %c2_268 = arith.constant 2 : index
    %c0_269 = arith.constant 0 : index
    %c0_270 = arith.constant 0 : index
    %421 = vector.load %arg4[%c2_268, %c0_269, %c0_270] : memref<3x64x64xbf16, #tpu.memory_space<vmem>>, vector<1x64x64xbf16>
    %422 = vector.shape_cast %421 : vector<1x64x64xbf16> to vector<64x64xbf16>
    %cst_271 = arith.constant dense<0.000000e+00> : vector<8x64xf32>
    %423 = tpu.matmul %392, %422, %cst_271 {dimension_numbers = #tpu.dot_dimension_numbers<[1], [0], [0], [1], [0, 0, 1, 1], [], []>} : vector<8x64xbf16>, vector<64x64xbf16>, vector<8x64xf32> -> vector<8x64xf32>
    %c0_272 = arith.constant 0 : index
    %c0_273 = arith.constant 0 : index
    %424 = vector.load %arg6[%c0_272, %c0_273] : memref<1x64xf32, #tpu.memory_space<vmem>>, vector<1x64xf32>
    %425 = vector.broadcast %424 : vector<1x64xf32> to vector<8x64xf32>
    %426 = arith.addf %423, %425 : vector<8x64xf32>
    %427 = arith.mulf %405, %426 : vector<8x64xf32>
    %428 = arith.addf %420, %427 : vector<8x64xf32>
    %429 = math.tanh %428 : vector<8x64xf32>
    %cst_274 = arith.constant 1.000000e+00 : f32
    %430 = vector.broadcast %cst_274 : f32 to vector<8x64xf32>
    %431 = arith.subf %430, %418 : vector<8x64xf32>
    %432 = arith.mulf %431, %429 : vector<8x64xf32>
    %433 = arith.mulf %418, %391 : vector<8x64xf32>
    %434 = arith.addf %432, %433 : vector<8x64xf32>
    %c7_i32_275 = arith.constant 7 : i32
    %c0_i32_276 = arith.constant 0 : i32
    %435 = vector.broadcast %c7_i32_275 : i32 to vector<8x64xi32>
    %436 = vector.broadcast %c0_i32_276 : i32 to vector<8x64xi32>
    %437 = arith.select %47, %435, %436 : vector<8x64xi1>, vector<8x64xi32>
    %438 = vector.broadcast %44 : vector<8x1xi32> to vector<8x64xi32>
    %439 = arith.cmpi sgt, %438, %437 : vector<8x64xi32>
    %440 = arith.select %439, %434, %391 : vector<8x64xi1>, vector<8x64xf32>
    %441 = arith.truncf %440 : vector<8x64xf32> to vector<8x64xbf16>
    %c0_277 = arith.constant 0 : index
    %c0_278 = arith.constant 0 : index
    %442 = vector.load %arg7[%c0_277, %c0_278] : memref<64x128xbf16, #tpu.memory_space<vmem>>, vector<64x128xbf16>
    %cst_279 = arith.constant dense<0.000000e+00> : vector<8x128xf32>
    %443 = tpu.matmul %441, %442, %cst_279 {dimension_numbers = #tpu.dot_dimension_numbers<[1], [0], [0], [1], [0, 0, 1, 1], [], []>} : vector<8x64xbf16>, vector<64x128xbf16>, vector<8x128xf32> -> vector<8x128xf32>
    %c0_280 = arith.constant 0 : index
    %c0_281 = arith.constant 0 : index
    %444 = vector.load %arg8[%c0_280, %c0_281] : memref<1x128xf32, #tpu.memory_space<vmem>>, vector<1x128xf32>
    %445 = vector.broadcast %444 : vector<1x128xf32> to vector<8x128xf32>
    %446 = arith.addf %443, %445 : vector<8x128xf32>
    %c0_282 = arith.constant 0 : index
    %c0_283 = arith.constant 0 : index
    %447 = vector.load %arg9[%c0_282, %c0_283] : memref<8x128xf32, #tpu.memory_space<vmem>>, vector<8x128xf32>
    tpu.vector_store %arg9[%c0_282, %c0_283], %446 {strides = array<i32>} : memref<8x128xf32, #tpu.memory_space<vmem>>, vector<8x128xf32>,
    return
  }
}

</mosaic_0001>

<bundles_post_ra>
// kernel: rnn_classifier_forward.1
= control target key start
LH: loop header
LB: loop body
LE: loop exit
PB: predicated region body
PF: predicated region fallthrough
CT: control target
= control target key end

     0   :  { %14 = vsyncpa [#allocation4], 0  ;;  %s1931_s0 = inlined_call_operand.vmem [shape: s32[8,1], index: 0, kind: input, shape index: {}]   ;;  %s1932_s1 = inlined_call_operand.vmem [shape: s32[64,1], index: 1, kind: input, shape index: {}]   ;;  %s1933_s2 = inlined_call_operand.vmem [shape: s32[64,1], index: 2, kind: input, shape index: {}]   ;;  %s1934_s3 = inlined_call_operand.vmem [shape: bf16[3,64,64], index: 3, kind: input, shape index: {}]   ;;  %s1935_s4 = inlined_call_operand.hbm [shape: bf16[3,64,64], index: 4, kind: input, shape index: {}]   ;;  %s1936_s5 = inlined_call_operand.vmem [shape: f32[3,1,64], index: 5, kind: input, shape index: {}]   ;;  %s1937_s6 = inlined_call_operand.vmem [shape: f32[1,64], index: 6, kind: input, shape index: {}]   ;;  %s1938_s7 = inlined_call_operand.vmem [shape: bf16[64,128], index: 7, kind: input, shape index: {}]   ;;  %s1939_s8 = inlined_call_operand.vmem [shape: f32[1,128], index: 8, kind: input, shape index: {}]   ;;  %s1940_s9 = inlined_call_operand.hbm [shape: f32[8,128], index: 9, kind: output, shape index: {}]  }
   0x1   :  { %15 = vsyncpa [#allocation5], 0  ;;  %s28_s11 = sshll.u32 %s1935_s4, 4  ;;  %s1416_s12 = smov [#allocation3]   ;;  %s29_s11 = int_to_ptr.hbm [resolvable:$true] %s28_s11 }
   0x2   :  { %s30_s13 = sshll.u32 %s1416_s12, 4  ;;  %s1417_s14 = smov 64   ;;  %s31_s13 = int_to_ptr.vmem [resolvable:$true] %s30_s13 }
   0x3   :  { %s1418_s15 = smov 4  }
   0x4   :  { %36 = dma.hbm_to_vmem [thread:$0]  %s29_s11, 1536, %s31_s13, [#allocation4], %s1417_s14, %s1417_s14, %s1418_s15  }
   0x5   :  { %1412 = dma.done.wait [#allocation4], 1536  }
   0x6   :  { %1413 = vsyncadd [#allocation4], 4294965760  ;;  %v1419_v0 = vmov 0   ;;  %v52_v1 = vld [vmem:[%s1932_s1] sm:$0xff]  ;;  %v54_v4 = vld [vmem:[%s1932_s1 + $0x10] sm:$0xff]  ;;  %v50_v50 = vlaneseq  ;;  %v1420_v57 = vmov 0.0  }
   0x7   :  { %1308 = vset.pattern.permute.xlu0 %v1419_v0  ;;  %1309 = vset.pattern.permute.xlu1 %v1419_v0  ;;  %v92_v2 = vld [vmem:[%s1933_s2] sm:$0xff]  ;;  %v93_v5 = vld [vmem:[%s1933_s2 + $0x8] sm:$0xff]  ;;  %v55_v8 = vld [vmem:[%s1932_s1 + $0x18] sm:$0xff]  ;;  %vm196_vm6 = vcmask 523264   ;;  %s1428_s16 = smov [#allocation6]   ;;  %s1093_s19 = sshll.u32 %s1940_s9, 4  ;;  %s1094_s19 = int_to_ptr.hbm [resolvable:$true] %s1093_s19 }
   0x8   :  { %1310 = vset.pattern.permute.xlu2 %v1419_v0  ;;  %61 = vperm.xlu0 %1308, %v52_v1   ;;  %v100_v3 = vadd.s32 32, %v92_v2  ;;  %v53_v6 = vld [vmem:[%s1932_s1 + $0x8] sm:$0xff]  ;;  %v101_v7 = vadd.s32 32, %v93_v5  ;;  %v94_v9 = vld [vmem:[%s1933_s2 + $0x10] sm:$0xff]  ;;  %v1506_v10 = vld [vmem:[#allocation3 + $0x18] sm:$0xff]  ;;  %v1626_v53 = vand.u32 127, %v50_v50 }
   0x9   :  { %67 = vperm.xlu2 %1310, %v54_v4   ;;  %v95_v11 = vld [vmem:[%s1933_s2 + $0x18] sm:$0xff]  ;;  %v102_v12 = vadd.s32 32, %v94_v9  ;;  %440 = vmatpush.bf16.msra.mxu3 %v1506_v10  ;;  %v1512_v13 = vld [vmem:[#allocation3 + $0x10] sm:$0xff]  ;;  %v56_v15 = vld [vmem:[%s1932_s1 + $0x20] sm:$0xff]  ;;  %s1091_s17 = sshll.u32 %s1428_s16, 4  ;;  %s1092_s17 = int_to_ptr.vmem [resolvable:$true] %s1091_s17 }
   0xa   :  { %109 = vperm.xlu1 %1309, %v100_v3   ;;  %v103_v14 = vadd.s32 32, %v95_v11  ;;  %v1518_v16 = vld [vmem:[#allocation3 + $0x8] sm:$0xff]  ;;  %v96_v17 = vld [vmem:[%s1933_s2 + $0x20] sm:$0xff]  ;;  %v1532_v21 = vld [vmem:[#allocation3 + $0x38] sm:$0xff]  ;;  %vm399_vm14 = vcmp.lt.s32.totalorder %v1626_v53, 32 }
   0xb   :  { %v97_v18 = vld [vmem:[%s1933_s2 + $0x28] sm:$0xff]  ;;  %v1527_v19 = vld [vmem:[#allocation3] sm:$0xff]  ;;  %v104_v22 = vadd.s32 32, %v96_v17  ;;  %v1536_v24 = vld [vmem:[#allocation3 + $0x30] sm:$0xff] }
   0xc   :  { %v57_v20 = vld [vmem:[%s1932_s1 + $0x28] sm:$0xff]  ;;  %v105_v23 = vadd.s32 32, %v97_v18  ;;  %v98_v25 = vld [vmem:[%s1933_s2 + $0x30] sm:$0xff]  ;;  %v59_v28 = vld [vmem:[%s1932_s1 + $0x38] sm:$0xff]  ;;  %v1423_v18 = vmov 2  }
   0xd   :  { %441 = vmatpush.bf16.msra.mxu3 %v1512_v13  ;;  %v58_v26 = vld [vmem:[%s1932_s1 + $0x30] sm:$0xff]  ;;  %v106_v27 = vadd.s32 32, %v98_v25  ;;  %v99_v29 = vld [vmem:[%s1933_s2 + $0x38] sm:$0xff]  ;;  %v398_v31 = vld [vmem:[%s1931_s0] sm:$0xff]  ;;  %v1425_v25 = vmov 5  }
   0xe   :  { %v107_v30 = vadd.s32 32, %v99_v29  ;;  %v1270_v32 = vld [vmem:[%s1934_s3 + $0x18] sm:$0xff]  ;;  %v1564_v35 = vld [vmem:[#allocation3 + $0x28] sm:$0xff]  ;;  %v1269_v36 = vld [vmem:[%s1934_s3 + $0x10] sm:$0xff] }
   0xf   :  { %v1274_v33 = vld [vmem:[%s1934_s3 + $0x38] sm:$0xff]  ;;  %213 = vmatpush.bf16.msra.mxu0 %v1270_v32  ;;  %v1273_v37 = vld [vmem:[%s1934_s3 + $0x30] sm:$0xff]  ;;  %v1576_v39 = vld [vmem:[#allocation3 + $0x20] sm:$0xff] }
  0x10   :  { %64 = vperm.xlu0 %1308, %v53_v6   ;;  %v1278_v34 = vld [vmem:[%s1934_s3 + $0x58] sm:$0xff]  ;;  %288 = vmatpush.bf16.msra.mxu1 %v1274_v33  ;;  %v1277_v38 = vld [vmem:[%s1934_s3 + $0x50] sm:$0xff]  ;;  %v1268_v40 = vld [vmem:[%s1934_s3 + $0x8] sm:$0xff] }
  0x11   :  { %70 = vperm.xlu2 %1310, %v55_v8   ;;  %442 = vmatpush.bf16.msra.mxu3 %v1518_v16  ;;  %v1272_v41 = vld [vmem:[%s1934_s3 + $0x28] sm:$0xff]  ;;  %v1588_v43 = vld [vmem:[#allocation3 + $0x58] sm:$0xff]  ;;  %v1267_v44 = vld [vmem:[%s1934_s3] sm:$0xff] }
  0x12   :  { %112 = vperm.xlu1 %1309, %v101_v7   ;;  %364 = vmatpush.bf16.msra.mxu2 %v1278_v34  ;;  %v1276_v42 = vld [vmem:[%s1934_s3 + $0x48] sm:$0xff]  ;;  %v1271_v45 = vld [vmem:[%s1934_s3 + $0x20] sm:$0xff]  ;;  %v1601_v47 = vld [vmem:[#allocation3 + $0x50] sm:$0xff] }
  0x13   :  { %214 = vmatpush.bf16.msra.mxu0 %v1269_v36  ;;  %v1275_v46 = vld [vmem:[%s1934_s3 + $0x40] sm:$0xff]  ;;  %v1607_v48 = vld [vmem:[#allocation3 + $0x48] sm:$0xff] }
  0x14   :  { %289 = vmatpush.bf16.msra.mxu1 %v1273_v37  ;;  %v1613_v49 = vld [vmem:[#allocation3 + $0x40] sm:$0xff] }
  0x15   :  { %443 = vmatpush.bf16.msra.mxu3 %v1527_v19  ;;  %v1736_v50 = vld [vmem:[%s1936_s5] ss:$0 sm:$0xff] }
  0x16   :  { %365 = vmatpush.bf16.msra.mxu2 %v1277_v38 }
  0x17   :  { %215 = vmatpush.bf16.msra.mxu0 %v1268_v40 }
  0x18   :  { %115 = vperm.xlu0 %1308, %v102_v12   ;;  %444 = vmatmul.bf16.vlgmr.msra.gmra.mxu3 %v1419_v0  ;;  %v1421_v12 = vmov 4  }
  0x19   :  { %73 = vperm.xlu2 %1310, %v56_v15   ;;  %492 = vmatpush.bf16.msrb.mxu3 %v1532_v21  ;;  %v1422_v15 = vmov 3  }
  0x1a   :  { %118 = vperm.xlu1 %1309, %v103_v14   ;;  %290 = vmatpush.bf16.msra.mxu1 %v1272_v41  ;;  %v1674_v14 = vsel %vm399_vm14, 3, %v1421_v12  ;;  %v1678_v17 = vsel %vm399_vm14, 4, %v1422_v15 }
  0x1b   :  { %366 = vmatpush.bf16.msra.mxu2 %v1276_v42  ;;  %216 = vmatpush.bf16.msra.mxu0 %v1267_v44 }
  0x1d   :  { %493 = vmatpush.bf16.msrb.mxu3 %v1536_v24 }
  0x1e   :  { %291 = vmatpush.bf16.msra.mxu1 %v1271_v45 }
  0x1f   :  { %367 = vmatpush.bf16.msra.mxu2 %v1275_v46  ;;  %598 = vmatpush.bf16.msrb.mxu0 %v1532_v21 }
  0x20   :  { %76 = vperm.xlu0 %1308, %v57_v20   ;;  %v1682_v20 = vsel %vm399_vm14, 5, %v1423_v18  ;;  %v1765_v18 = vld [vmem:[%s1937_s6] ss:$0 sm:$0xff] }
  0x21   :  { %124 = vperm.xlu2 %1310, %v105_v23   ;;  %494 = vmatpush.bf16.msrb.mxu3 %v1564_v35 }
  0x22   :  { %121 = vperm.xlu1 %1309, %v104_v22   ;;  %617 = vmatpush.bf16.msrb.mxu1 %v1588_v43  ;;  %v1424_v22 = vmov 6  }
  0x23   :  { %645 = vmatpush.bf16.msrb.mxu2 %v1506_v10  ;;  %599 = vmatpush.bf16.msrb.mxu0 %v1536_v24  ;;  %v1686_v23 = vsel %vm399_vm14, 1, %v1424_v22 }
  0x25   :  { %495 = vmatpush.bf16.msrb.mxu3 %v1576_v39 }
  0x26   :  { %618 = vmatpush.bf16.msrb.mxu1 %v1601_v47 }
  0x27   :  { %646 = vmatpush.bf16.msrb.mxu2 %v1512_v13  ;;  %600 = vmatpush.bf16.msrb.mxu0 %v1564_v35 }
  0x28   :  { %79 = vperm.xlu0 %1308, %v58_v26   ;;  %496 = vmatmul.bf16.vlgmr.msrb.gmra.mxu3 %v1419_v0  ;;  %v1690_v26 = vsel %vm399_vm14, 2, %v1425_v25 }
  0x29   :  { %127 = vperm.xlu2 %1310, %v106_v27   ;;  %548 = vmatpush.bf16.msra.mxu3 %v1588_v43 }
  0x2a   :  { %82 = vperm.xlu1 %1309, %v59_v28   ;;  %619 = vmatpush.bf16.msrb.mxu1 %v1607_v48  ;;  %v1426_v28 = vmov 1  }
  0x2b   :  { %647 = vmatpush.bf16.msrb.mxu2 %v1518_v16  ;;  %601 = vmatpush.bf16.msrb.mxu0 %v1576_v39  ;;  %v1696_v29 = vsel %vm399_vm14, 6, %v1426_v28 }
  0x2d   :  { %549 = vmatpush.bf16.msra.mxu3 %v1601_v47 }
  0x2e   :  { %620 = vmatpush.bf16.msrb.mxu1 %v1613_v49 }
  0x2f   :  { %648 = vmatpush.bf16.msrb.mxu2 %v1527_v19 }
  0x30   :  { %130 = vperm.xlu0 %1308, %v107_v30   ;;  %v1701_v30 = vsel %vm399_vm14, 7, %v1419_v0 }
  0x31   :  { %550 = vmatpush.bf16.msra.mxu3 %v1607_v48 }
  0x32   :  { %566 = vperm.xlu1 %1309, %v398_v31  }
  0x35   :  { %551 = vmatpush.bf16.msra.mxu3 %v1613_v49 }
  0x38   :  { %552 = vmatmul.bf16.vlgmr.msra.gmra.mxu3 %v1419_v0 }
  0x39   :  { %579 = vmatpush.bf16.msrb.mxu3 %v1506_v10 }
  0x3d   :  { %580 = vmatpush.bf16.msrb.mxu3 %v1512_v13 }
  0x41   :  { %581 = vmatpush.bf16.msrb.mxu3 %v1518_v16 }
  0x45   :  { %582 = vmatpush.bf16.msrb.mxu3 %v1527_v19 }
  0x49   :  { %664 = vmatpush.bf16.msra.mxu3 %v1532_v21 }
  0x4d   :  { %665 = vmatpush.bf16.msra.mxu3 %v1536_v24 }
  0x51   :  { %666 = vmatpush.bf16.msra.mxu3 %v1564_v35 }
  0x55   :  { %667 = vmatpush.bf16.msra.mxu3 %v1576_v39 }
  0x63   :  { %v68_v54 = vpop.permute.xlu2 %67 }
  0x64   :  { %vm86_vm9 = vcmp.eq.s32.totalorder %v1626_v53, %v68_v54 }
  0x6b   :  { %v71_v61 = vpop.permute.xlu2 %70 }
  0x6c   :  { %vm87_vm7 = vcmp.eq.s32.totalorder %v1626_v53, %v71_v61 }
  0x73   :  { %v74_v1 = vpop.permute.xlu2 %73 }
  0x74   :  { %vm88_vm13 = vcmp.eq.s32.totalorder %v1626_v53, %v74_v1 }
  0x7a   :  { %v62_v51 = vpop.permute.xlu0 %61 }
  0x7b   :  { %vm84_vm0 = vcmp.eq.s32.totalorder %v1626_v53, %v62_v51  ;;  %v125_v8 = vpop.permute.xlu2 %124  ;;  %v1741_v51 = vld [vmem:[%s1936_s5 + $0x1] ss:$0 sm:$0xff] }
  0x7c   :  { %v110_v52 = vpop.permute.xlu1 %109 }
  0x7d   :  { %vm132_vm1 = vcmp.eq.s32.totalorder %v1626_v53, %v110_v52 }
  0x7e   :  { %vm140_vm2 = vmor %vm84_vm0, %vm132_vm1  ;;  %vm137_vm0 = vcmp.eq.s32.totalorder %v1626_v53, %v125_v8 }
  0x7f   :  { %v148_v58 = vsel %vm140_vm2, 1.0, %v1420_v57 }
  0x82   :  { %v65_v55 = vpop.permute.xlu0 %64 }
  0x83   :  { %vm85_vm3 = vcmp.eq.s32.totalorder %v1626_v53, %v65_v55  ;;  %v128_v36 = vpop.permute.xlu2 %127 }
  0x84   :  { %v113_v56 = vpop.permute.xlu1 %112 }
  0x85   :  { %vm133_vm4 = vcmp.eq.s32.totalorder %v1626_v53, %v113_v56 }
  0x86   :  { %vm141_vm5 = vmor %vm85_vm3, %vm133_vm4 }
  0x87   :  { %v149_v59 = vsel %vm141_vm5, 1.0, %v1420_v57 }
  0x88   :  { %v156_v60 = vpack.c.bf16 %v149_v59, %v148_v58 }
  0x8a   :  { %1119 = vmatmul.msk.bf16.vlgmr.msra.gmra.mxu0 %vm196_vm6, %v156_v60  ;;  %1148 = vmatmul.msk.bf16.vlgmr.msra.gmra.mxu1 %vm196_vm6, %v156_v60  ;;  %v116_v63 = vpop.permute.xlu0 %115 }
  0x8b   :  { %1177 = vmatmul.msk.bf16.vlgmr.msra.gmra.mxu2 %vm196_vm6, %v156_v60  ;;  %683 = vmatpush.bf16.msra.mxu0 %v1588_v43  ;;  %vm134_vm10 = vcmp.eq.s32.totalorder %v1626_v53, %v116_v63 }
  0x8c   :  { %v119_v62 = vpop.permute.xlu1 %118  ;;  %711 = vmatpush.bf16.msra.mxu1 %v1506_v10  ;;  %730 = vmatpush.bf16.msra.mxu2 %v1532_v21  ;;  %vm142_vm12 = vmor %vm86_vm9, %vm134_vm10 }
  0x8d   :  { %vm135_vm8 = vcmp.eq.s32.totalorder %v1626_v53, %v119_v62  ;;  %v150_v4 = vsel %vm142_vm12, 1.0, %v1420_v57 }
  0x8e   :  { %vm143_vm11 = vmor %vm87_vm7, %vm135_vm8 }
  0x8f   :  { %684 = vmatpush.bf16.msra.mxu0 %v1601_v47  ;;  %v151_v3 = vsel %vm143_vm11, 1.0, %v1420_v57 }
  0x90   :  { %712 = vmatpush.bf16.msra.mxu1 %v1512_v13  ;;  %731 = vmatpush.bf16.msra.mxu2 %v1536_v24  ;;  %v157_v5 = vpack.c.bf16 %v151_v3, %v150_v4 }
  0x92   :  { %v77_v6 = vpop.permute.xlu0 %76 }
  0x93   :  { %685 = vmatpush.bf16.msra.mxu0 %v1607_v48  ;;  %vm89_vm1 = vcmp.eq.s32.totalorder %v1626_v53, %v77_v6 }
  0x94   :  { %v122_v2 = vpop.permute.xlu1 %121  ;;  %713 = vmatpush.bf16.msra.mxu1 %v1518_v16  ;;  %732 = vmatpush.bf16.msra.mxu2 %v1564_v35  ;;  %vm145_vm3 = vmor %vm89_vm1, %vm137_vm0 }
  0x95   :  { %vm136_vm15 = vcmp.eq.s32.totalorder %v1626_v53, %v122_v2  ;;  %v153_v0 = vsel %vm145_vm3, 1.0, %v1420_v57 }
  0x96   :  { %vm1668_vm2 = vmor %vm88_vm13, %vm136_vm15  ;;  %vm138_vm13 = vcmp.eq.s32.totalorder %v1626_v53, %v128_v36 }
  0x97   :  { %686 = vmatpush.bf16.msra.mxu0 %v1613_v49  ;;  %v152_v31 = vsel %vm1668_vm2, 1.0, %v1420_v57 }
  0x98   :  { %714 = vmatpush.bf16.msra.mxu1 %v1527_v19  ;;  %733 = vmatpush.bf16.msra.mxu2 %v1576_v39  ;;  %v158_v33 = vpack.c.bf16 %v153_v0, %v152_v31 }
  0x9a   :  { %1120 = vmatmul.msk.bf16.gmra.mxu0 %vm196_vm6, %v157_v5  ;;  %1149 = vmatmul.msk.bf16.gmra.mxu1 %vm196_vm6, %v157_v5  ;;  %v80_v11 = vpop.permute.xlu0 %79 }
  0x9b   :  { %1178 = vmatmul.msk.bf16.gmra.mxu2 %vm196_vm6, %v157_v5  ;;  %v445_v32 = vpop.f32.mrf.mxu3  ;;  %vm90_vm15 = vcmp.eq.s32.totalorder %v1626_v53, %v80_v11 }
  0x9c   :  { %v83_v7 = vpop.permute.xlu1 %82  ;;  %vm146_vm2 = vmor %vm90_vm15, %vm138_vm13 }
  0x9d   :  { %vm91_vm0 = vcmp.eq.s32.totalorder %v1626_v53, %v83_v7  ;;  %v154_v40 = vsel %vm146_vm2, 1.0, %v1420_v57 }
  0xa2   :  { %v131_v34 = vpop.permute.xlu0 %130 }
  0xa3   :  { %v447_v37 = vpop.f32.mrf.mxu3  ;;  %vm139_vm12 = vcmp.eq.s32.totalorder %v1626_v53, %v131_v34 }
  0xa4   :  { %v1692_v27 = vpop.permute.xlu1 %566  ;;  %vm147_vm1 = vmor %vm91_vm0, %vm139_vm12 }
  0xa5   :  { %vm766_vm4 = vcmp.gt.s32.totalorder %v1692_v27, %v1674_v14  ;;  %vm832_vm5 = vcmp.gt.s32.totalorder %v1692_v27, %v1678_v17  ;;  %vm898_vm7 = vcmp.gt.s32.totalorder %v1692_v27, %v1682_v20  ;;  %vm634_vm8 = vcmp.gt.s32.totalorder %v1692_v27, %v1686_v23 }
  0xa6   :  { %vm700_vm9 = vcmp.gt.s32.totalorder %v1692_v27, %v1690_v26  ;;  %vm964_vm10 = vcmp.gt.s32.totalorder %v1692_v27, %v1696_v29  ;;  %vm1030_vm11 = vcmp.gt.s32.totalorder %v1692_v27, %v1701_v30  ;;  %v155_v38 = vsel %vm147_vm1, 1.0, %v1420_v57  ;;  %v1750_v57 = vld [vmem:[%s1936_s5 + $0x2] ss:$0 sm:$0xff]  ;;  %v1292_v29 = vld [vmem:[%s1938_s7 + $0x8] sm:$0xff] }
  0xa7   :  { %v159_v41 = vpack.c.bf16 %v155_v38, %v154_v40 }
  0xaa   :  { %1121 = vmatmul.msk.bf16.gmra.mxu0 %vm196_vm6, %v158_v33  ;;  %1150 = vmatmul.msk.bf16.gmra.mxu1 %vm196_vm6, %v158_v33 }
  0xab   :  { %1179 = vmatmul.msk.bf16.gmra.mxu2 %vm196_vm6, %v158_v33  ;;  %v497_v42 = vpop.f32.mrf.mxu3 }
  0xb3   :  { %v499_v44 = vpop.f32.mrf.mxu3 }
  0xba   :  { %1122 = vmatmul.msk.bf16.gmra.mxu0 %vm196_vm6, %v159_v41  ;;  %1151 = vmatmul.msk.bf16.gmra.mxu1 %vm196_vm6, %v159_v41 }
  0xbb   :  { %1180 = vmatmul.msk.bf16.gmra.mxu2 %vm196_vm6, %v159_v41  ;;  %v553_v45 = vpop.f32.mrf.mxu3 }
  0xbc   :  { %v554_v28 = vadd.f32 %v1765_v18, %v553_v45 }
  0xc3   :  { %v555_v46 = vpop.f32.mrf.mxu3 }
 0x107   :  { %v218_v52 = vpop.f32.mrf.mxu0  ;;  %v293_v54 = vpop.f32.mrf.mxu1 }
 0x108   :  { %v219_v55 = vadd.f32 %v1736_v50, %v218_v52  ;;  %v294_v56 = vadd.f32 %v1741_v51, %v293_v54 }
 0x10a   :  { %238 = vst.msk [vmem:[#allocation2] sm:$0xff] %vm196_vm6, %v219_v55 }
 0x10b   :  { %314 = vst.msk [vmem:[#allocation2 + $0x40] sm:$0xff] %vm196_vm6, %v294_v56 }
 0x10e   :  { %v369_v58 = vpop.f32.mrf.mxu2 }
 0x10f   :  { %v370_v59 = vadd.f32 %v1750_v57, %v369_v58  ;;  %v220_v60 = vpop.f32.mrf.mxu0  ;;  %v295_v61 = vpop.f32.mrf.mxu1 }
 0x110   :  { %v221_v62 = vadd.f32 %v1736_v50, %v220_v60  ;;  %v296_v63 = vadd.f32 %v1741_v51, %v295_v61 }
 0x111   :  { %390 = vst.msk [vmem:[#allocation2 + $0x80] sm:$0xff] %vm196_vm6, %v370_v59  ;;  %v400_v1 = vld [vmem:[#allocation2] sm:$0xff] }
 0x112   :  { %239 = vst.msk [vmem:[#allocation2 + $0x8] sm:$0xff] %vm196_vm6, %v221_v62  ;;  %v449_v2 = vadd.f32 %v445_v32, %v400_v1  ;;  %v454_v3 = vld [vmem:[#allocation2 + $0x40] sm:$0xff] }
 0x113   :  { %315 = vst.msk [vmem:[#allocation2 + $0x48] sm:$0xff] %vm196_vm6, %v296_v63  ;;  %v501_v4 = vadd.f32 %v497_v42, %v454_v3  ;;  %v1427_v63 = vmov 7  }
 0x114   :  { %v450_v5 = vmul.f32 0.5, %v449_v2  ;;  %v564_v1 = vsel %vm399_vm14, 0, %v1427_v63 }
 0x115   :  { %v502_v6 = vmul.f32 0.5, %v501_v4  ;;  %vm568_vm3 = vcmp.gt.s32.totalorder %v1692_v27, %v564_v1 }
 0x116   :  { %v371_v7 = vpop.f32.mrf.mxu2  ;;  %1316 = vtanh.f32 %v450_v5 }
 0x117   :  { %v372_v8 = vadd.f32 %v1750_v57, %v371_v7  ;;  %v223_v9 = vpop.f32.mrf.mxu0  ;;  %v298_v11 = vpop.f32.mrf.mxu1  ;;  %1318 = vtanh.f32 %v502_v6 }
 0x118   :  { %v224_v12 = vadd.f32 %v1736_v50, %v223_v9  ;;  %v299_v15 = vadd.f32 %v1741_v51, %v298_v11  ;;  %v506_v42 = vld [vmem:[#allocation2 + $0x80] sm:$0xff] }
 0x119   :  { %391 = vst.msk [vmem:[#allocation2 + $0x88] sm:$0xff] %vm196_vm6, %v372_v8 }
 0x11a   :  { %240 = vst.msk [vmem:[#allocation2 + $0x10] sm:$0xff] %vm196_vm6, %v224_v12 }
 0x11b   :  { %316 = vst.msk [vmem:[#allocation2 + $0x50] sm:$0xff] %vm196_vm6, %v299_v15 }
 0x11c   :  { %v1317_v22 = vpop.eup %1316 }
 0x11d   :  { %v452_v25 = vmul.f32 0.5, %v1317_v22  ;;  %v1319_v32 = vpop.eup %1318 }
 0x11e   :  { %v374_v31 = vpop.f32.mrf.mxu2  ;;  %v504_v41 = vmul.f32 0.5, %v1319_v32 }
 0x11f   :  { %v453_v0 = vadd.f32 0.5, %v452_v25  ;;  %v375_v33 = vadd.f32 %v1750_v57, %v374_v31  ;;  %v225_v34 = vpop.f32.mrf.mxu0  ;;  %v300_v36 = vpop.f32.mrf.mxu1 }
 0x120   :  { %v226_v37 = vadd.f32 %v1736_v50, %v225_v34  ;;  %v301_v38 = vadd.f32 %v1741_v51, %v300_v36  ;;  %v505_v45 = vadd.f32 0.5, %v504_v41  ;;  %v612_v1 = vld [vmem:[#allocation2 + $0x88] sm:$0xff] }
 0x121   :  { %v557_v40 = vmul.f32 %v554_v28, %v453_v0  ;;  %392 = vst.msk [vmem:[#allocation2 + $0x90] sm:$0xff] %vm196_vm6, %v375_v33 }
 0x122   :  { %241 = vst.msk [vmem:[#allocation2 + $0x18] sm:$0xff] %vm196_vm6, %v226_v37  ;;  %v560_v59 = vsub.f32 1.0, %v505_v45  ;;  %v562_v62 = vmul.f32 0.0, %v505_v45 }
 0x123   :  { %v558_v44 = vadd.f32 %v557_v40, %v506_v42  ;;  %317 = vst.msk [vmem:[#allocation2 + $0x58] sm:$0xff] %vm196_vm6, %v301_v38  ;;  %v571_v42 = vld [vmem:[#allocation2 + $0x8] sm:$0xff] }
 0x125   :  { %1320 = vtanh.f32 %v558_v44 }
 0x126   :  { %v376_v46 = vpop.f32.mrf.mxu2 }
 0x127   :  { %v377_v52 = vadd.f32 %v1750_v57, %v376_v46  ;;  %v228_v54 = vpop.f32.mrf.mxu0  ;;  %v303_v55 = vpop.f32.mrf.mxu1 }
 0x128   :  { %v229_v56 = vadd.f32 %v1736_v50, %v228_v54  ;;  %v304_v58 = vadd.f32 %v1741_v51, %v303_v55 }
 0x129   :  { %393 = vst.msk [vmem:[#allocation2 + $0x98] sm:$0xff] %vm196_vm6, %v377_v52  ;;  %v703_v26 = vld [vmem:[#allocation2 + $0x18] sm:$0xff] }
 0x12a   :  { %242 = vst.msk [vmem:[#allocation2 + $0x20] sm:$0xff] %vm196_vm6, %v229_v56 }
 0x12b   :  { %v1321_v60 = vpop.eup %1320  ;;  %318 = vst.msk [vmem:[#allocation2 + $0x60] sm:$0xff] %vm196_vm6, %v304_v58 }
 0x12c   :  { %v561_v61 = vmul.f32 %v1321_v60, %v560_v59 }
 0x12e   :  { %v563_v2 = vadd.f32 %v562_v62, %v561_v61  ;;  %v379_v3 = vpop.f32.mrf.mxu2 }
 0x12f   :  { %v380_v4 = vadd.f32 %v1750_v57, %v379_v3  ;;  %v230_v5 = vpop.f32.mrf.mxu0  ;;  %v305_v6 = vpop.f32.mrf.mxu1 }
 0x130   :  { %v231_v7 = vadd.f32 %v1736_v50, %v230_v5  ;;  %v306_v8 = vadd.f32 %v1741_v51, %v305_v6  ;;  %v1788_v9 = vsel %vm568_vm3, %v563_v2, 0.0 }
 0x131   :  { %394 = vst.msk [vmem:[#allocation2 + $0xa0] sm:$0xff] %vm196_vm6, %v380_v4  ;;  %v570_v53 = vpack.c.bf16 %v1788_v9, %v1788_v9 }
 0x132   :  { %243 = vst.msk [vmem:[#allocation2 + $0x28] sm:$0xff] %vm196_vm6, %v231_v7  ;;  %v791_v14 = vld [vmem:[#allocation2 + $0x60] sm:$0xff] }
 0x133   :  { %319 = vst.msk [vmem:[#allocation2 + $0x68] sm:$0xff] %vm196_vm6, %v306_v8  ;;  %1229 = vmatmul.msk.bf16.vlgmr.msrb.gmra.mxu3 %vm196_vm6, %v570_v53  ;;  %1230 = vmatmul.msk.bf16.vlgmr.msrb.gmra.mxu0 %vm196_vm6, %v570_v53 }
 0x134   :  { %1231 = vmatmul.msk.bf16.vlgmr.msrb.gmra.mxu1 %vm196_vm6, %v570_v53  ;;  %749 = vmatpush.bf16.msrb.mxu3 %v1588_v43 }
 0x135   :  { %777 = vmatpush.bf16.msrb.mxu0 %v1506_v10  ;;  %796 = vmatpush.bf16.msrb.mxu1 %v1532_v21 }
 0x136   :  { %v381_v11 = vpop.f32.mrf.mxu2 }
 0x137   :  { %v382_v12 = vadd.f32 %v1750_v57, %v381_v11  ;;  %v233_v15 = vpop.f32.mrf.mxu0  ;;  %v308_v22 = vpop.f32.mrf.mxu1 }
 0x138   :  { %v234_v25 = vadd.f32 %v1736_v50, %v233_v15  ;;  %v309_v28 = vadd.f32 %v1741_v51, %v308_v22  ;;  %750 = vmatpush.bf16.msrb.mxu3 %v1601_v47  ;;  %v659_v15 = vld [vmem:[#allocation2 + $0x50] sm:$0xff] }
 0x139   :  { %395 = vst.msk [vmem:[#allocation2 + $0xa8] sm:$0xff] %vm196_vm6, %v382_v12  ;;  %778 = vmatpush.bf16.msrb.mxu0 %v1512_v13  ;;  %797 = vmatpush.bf16.msrb.mxu1 %v1536_v24 }
 0x13a   :  { %244 = vst.msk [vmem:[#allocation2 + $0x30] sm:$0xff] %vm196_vm6, %v234_v25 }
 0x13b   :  { %320 = vst.msk [vmem:[#allocation2 + $0x70] sm:$0xff] %vm196_vm6, %v309_v28 }
 0x13c   :  { %751 = vmatpush.bf16.msrb.mxu3 %v1607_v48 }
 0x13d   :  { %779 = vmatpush.bf16.msrb.mxu0 %v1518_v16  ;;  %798 = vmatpush.bf16.msrb.mxu1 %v1564_v35 }
 0x13e   :  { %v384_v31 = vpop.f32.mrf.mxu2 }
 0x13f   :  { %v385_v32 = vadd.f32 %v1750_v57, %v384_v31  ;;  %v235_v0 = vpop.f32.mrf.mxu0  ;;  %v310_v33 = vpop.f32.mrf.mxu1 }
 0x140   :  { %v236_v34 = vadd.f32 %v1736_v50, %v235_v0  ;;  %v311_v36 = vadd.f32 %v1741_v51, %v310_v33  ;;  %752 = vmatpush.bf16.msrb.mxu3 %v1613_v49  ;;  %v593_v51 = vld [vmem:[#allocation2 + $0x48] sm:$0xff] }
 0x141   :  { %396 = vst.msk [vmem:[#allocation2 + $0xb0] sm:$0xff] %vm196_vm6, %v385_v32  ;;  %780 = vmatpush.bf16.msrb.mxu0 %v1527_v19  ;;  %799 = vmatpush.bf16.msrb.mxu1 %v1576_v39 }
 0x142   :  { %245 = vst.msk [vmem:[#allocation2 + $0x38] sm:$0xff] %vm196_vm6, %v236_v34 }
 0x143   :  { %321 = vst.msk [vmem:[#allocation2 + $0x78] sm:$0xff] %vm196_vm6, %v311_v36 }
 0x146   :  { %v386_v37 = vpop.f32.mrf.mxu2 }
 0x147   :  { %v387_v38 = vadd.f32 %v1750_v57, %v386_v37 }
 0x149   :  { %397 = vst.msk [vmem:[#allocation2 + $0xb8] sm:$0xff] %vm196_vm6, %v387_v38 }
 0x1b0   :  { %v603_v50 = vpop.f32.mrf.mxu0 }
 0x1b1   :  { %v622_v40 = vpop.f32.mrf.mxu1  ;;  %v607_v41 = vadd.f32 %v603_v50, %v593_v51 }
 0x1b2   :  { %v623_v57 = vadd.f32 %v1765_v18, %v622_v40 }
 0x1b3   :  { %v608_v55 = vmul.f32 0.5, %v607_v41  ;;  %v678_v41 = vld [vmem:[#allocation2 + $0x90] sm:$0xff] }
 0x1b6   :  { %v584_v44 = vpop.f32.mrf.mxu3 }
 0x1b7   :  { %v588_v45 = vadd.f32 %v584_v44, %v571_v42 }
 0x1b8   :  { %v605_v46 = vpop.f32.mrf.mxu0 }
 0x1b9   :  { %v589_v52 = vmul.f32 0.5, %v588_v45  ;;  %v624_v54 = vpop.f32.mrf.mxu1 }
 0x1bb   :  { %1322 = vtanh.f32 %v589_v52 }
 0x1bc   :  { %1324 = vtanh.f32 %v608_v55 }
 0x1be   :  { %v586_v56 = vpop.f32.mrf.mxu3 }
 0x1c1   :  { %v1323_v58 = vpop.eup %1322 }
 0x1c2   :  { %v591_v59 = vmul.f32 0.5, %v1323_v58  ;;  %v1325_v60 = vpop.eup %1324 }
 0x1c3   :  { %v610_v63 = vmul.f32 0.5, %v1325_v60 }
 0x1c4   :  { %v592_v61 = vadd.f32 0.5, %v591_v59 }
 0x1c5   :  { %v611_v3 = vadd.f32 0.5, %v610_v63 }
 0x1c6   :  { %v626_v62 = vmul.f32 %v623_v57, %v592_v61 }
 0x1c7   :  { %v629_v4 = vsub.f32 1.0, %v611_v3  ;;  %v631_v6 = vmul.f32 %v611_v3, %v1788_v9 }
 0x1c8   :  { %v627_v2 = vadd.f32 %v626_v62, %v612_v1  ;;  %v725_v62 = vld [vmem:[#allocation2 + $0x58] sm:$0xff] }
 0x1ca   :  { %1326 = vtanh.f32 %v627_v2 }
 0x1d0   :  { %v1327_v5 = vpop.eup %1326 }
 0x1d1   :  { %v630_v7 = vmul.f32 %v1327_v5, %v629_v4 }
 0x1d3   :  { %v632_v8 = vadd.f32 %v631_v6, %v630_v7 }
 0x1d5   :  { %v635_v53 = vsel %vm634_vm8, %v632_v8, %v1788_v9  ;;  %v637_v9 = vld [vmem:[#allocation2 + $0x10] sm:$0xff] }
 0x1d6   :  { %v636_v11 = vpack.c.bf16 %v635_v53, %v635_v53 }
 0x1d8   :  { %1232 = vmatmul.msk.bf16.vlgmr.msrb.gmra.mxu2 %vm196_vm6, %v636_v11  ;;  %1233 = vmatmul.msk.bf16.vlgmr.msra.gmra.mxu3 %vm196_vm6, %v636_v11 }
 0x1d9   :  { %1234 = vmatmul.msk.bf16.vlgmr.msra.gmra.mxu0 %vm196_vm6, %v636_v11  ;;  %815 = vmatpush.bf16.msrb.mxu2 %v1588_v43 }
 0x1da   :  { %843 = vmatpush.bf16.msra.mxu3 %v1506_v10  ;;  %862 = vmatpush.bf16.msra.mxu0 %v1532_v21 }
 0x1dd   :  { %816 = vmatpush.bf16.msrb.mxu2 %v1601_v47 }
 0x1de   :  { %844 = vmatpush.bf16.msra.mxu3 %v1512_v13  ;;  %863 = vmatpush.bf16.msra.mxu0 %v1536_v24 }
 0x1e1   :  { %817 = vmatpush.bf16.msrb.mxu2 %v1607_v48 }
 0x1e2   :  { %845 = vmatpush.bf16.msra.mxu3 %v1518_v16  ;;  %864 = vmatpush.bf16.msra.mxu0 %v1564_v35 }
 0x1e5   :  { %818 = vmatpush.bf16.msrb.mxu2 %v1613_v49 }
 0x1e6   :  { %846 = vmatpush.bf16.msra.mxu3 %v1527_v19  ;;  %865 = vmatpush.bf16.msra.mxu0 %v1576_v39 }
 0x256   :  { %v688_v23 = vpop.f32.mrf.mxu0 }
 0x257   :  { %v689_v50 = vadd.f32 %v1765_v18, %v688_v23 }
 0x25b   :  { %v650_v12 = vpop.f32.mrf.mxu2  ;;  %v669_v22 = vpop.f32.mrf.mxu3 }
 0x25c   :  { %v654_v25 = vadd.f32 %v650_v12, %v637_v9  ;;  %v673_v28 = vadd.f32 %v669_v22, %v659_v15  ;;  %v744_v12 = vld [vmem:[#allocation2 + $0x98] sm:$0xff] }
 0x25e   :  { %v655_v31 = vmul.f32 0.5, %v654_v25  ;;  %v690_v32 = vpop.f32.mrf.mxu0  ;;  %v674_v0 = vmul.f32 0.5, %v673_v28 }
 0x260   :  { %1328 = vtanh.f32 %v655_v31 }
 0x261   :  { %1330 = vtanh.f32 %v674_v0 }
 0x263   :  { %v652_v33 = vpop.f32.mrf.mxu2  ;;  %v671_v34 = vpop.f32.mrf.mxu3 }
 0x266   :  { %v1329_v36 = vpop.eup %1328 }
 0x267   :  { %v657_v37 = vmul.f32 0.5, %v1329_v36  ;;  %v1331_v38 = vpop.eup %1330 }
 0x268   :  { %v676_v42 = vmul.f32 0.5, %v1331_v38 }
 0x269   :  { %v658_v40 = vadd.f32 0.5, %v657_v37 }
 0x26a   :  { %v677_v45 = vadd.f32 0.5, %v676_v42 }
 0x26b   :  { %v692_v51 = vmul.f32 %v689_v50, %v658_v40 }
 0x26c   :  { %v695_v46 = vsub.f32 1.0, %v677_v45  ;;  %v697_v55 = vmul.f32 %v677_v45, %v635_v53 }
 0x26d   :  { %v693_v44 = vadd.f32 %v692_v51, %v678_v41 }
 0x26f   :  { %1332 = vtanh.f32 %v693_v44 }
 0x275   :  { %v1333_v52 = vpop.eup %1332 }
 0x276   :  { %v696_v54 = vmul.f32 %v1333_v52, %v695_v46  ;;  %v810_v52 = vld [vmem:[#allocation2 + $0xa0] sm:$0xff] }
 0x278   :  { %v698_v56 = vadd.f32 %v697_v55, %v696_v54 }
 0x27a   :  { %v701_v58 = vsel %vm700_vm9, %v698_v56, %v635_v53 }
 0x27b   :  { %v702_v59 = vpack.c.bf16 %v701_v58, %v701_v58 }
 0x27d   :  { %1235 = vmatmul.msk.bf16.vlgmr.msra.gmra.mxu1 %vm196_vm6, %v702_v59  ;;  %1236 = vmatmul.msk.bf16.vlgmr.msra.gmra.mxu2 %vm196_vm6, %v702_v59 }
 0x27e   :  { %1237 = vmatmul.msk.bf16.vlgmr.msrb.gmra.mxu3 %vm196_vm6, %v702_v59  ;;  %881 = vmatpush.bf16.msra.mxu1 %v1588_v43 }
 0x27f   :  { %909 = vmatpush.bf16.msra.mxu2 %v1506_v10  ;;  %928 = vmatpush.bf16.msrb.mxu3 %v1532_v21 }
 0x282   :  { %882 = vmatpush.bf16.msra.mxu1 %v1601_v47 }
 0x283   :  { %910 = vmatpush.bf16.msra.mxu2 %v1512_v13  ;;  %929 = vmatpush.bf16.msrb.mxu3 %v1536_v24 }
 0x286   :  { %883 = vmatpush.bf16.msra.mxu1 %v1607_v48 }
 0x287   :  { %911 = vmatpush.bf16.msra.mxu2 %v1518_v16  ;;  %930 = vmatpush.bf16.msrb.mxu3 %v1564_v35 }
 0x28a   :  { %884 = vmatpush.bf16.msra.mxu1 %v1613_v49 }
 0x28b   :  { %912 = vmatpush.bf16.msra.mxu2 %v1527_v19  ;;  %931 = vmatpush.bf16.msrb.mxu3 %v1576_v39 }
 0x2fa   :  { %v716_v60 = vpop.f32.mrf.mxu1 }
 0x2fb   :  { %v720_v57 = vadd.f32 %v716_v60, %v703_v26 }
 0x2fd   :  { %v721_v61 = vmul.f32 0.5, %v720_v57 }
 0x2ff   :  { %1334 = vtanh.f32 %v721_v61 }
 0x300   :  { %v735_v63 = vpop.f32.mrf.mxu2 }
 0x301   :  { %v739_v1 = vadd.f32 %v735_v63, %v725_v62  ;;  %v754_v2 = vpop.f32.mrf.mxu3 }
 0x302   :  { %v718_v3 = vpop.f32.mrf.mxu1  ;;  %v755_v8 = vadd.f32 %v1765_v18, %v754_v2  ;;  %v835_v2 = vld [vmem:[#allocation2 + $0x28] sm:$0xff] }
 0x303   :  { %v740_v4 = vmul.f32 0.5, %v739_v1  ;;  %v857_v1 = vld [vmem:[#allocation2 + $0x68] sm:$0xff] }
 0x305   :  { %v1335_v5 = vpop.eup %1334  ;;  %1336 = vtanh.f32 %v740_v4 }
 0x306   :  { %v723_v6 = vmul.f32 0.5, %v1335_v5 }
 0x308   :  { %v724_v7 = vadd.f32 0.5, %v723_v6  ;;  %v737_v53 = vpop.f32.mrf.mxu2 }
 0x309   :  { %v756_v11 = vpop.f32.mrf.mxu3 }
 0x30a   :  { %v758_v23 = vmul.f32 %v755_v8, %v724_v7 }
 0x30b   :  { %v1337_v9 = vpop.eup %1336 }
 0x30c   :  { %v742_v15 = vmul.f32 0.5, %v1337_v9  ;;  %v759_v22 = vadd.f32 %v758_v23, %v744_v12  ;;  %v876_v12 = vld [vmem:[#allocation2 + $0xa8] sm:$0xff] }
 0x30e   :  { %1338 = vtanh.f32 %v759_v22  ;;  %v743_v25 = vadd.f32 0.5, %v742_v15 }
 0x310   :  { %v761_v28 = vsub.f32 1.0, %v743_v25  ;;  %v763_v32 = vmul.f32 %v743_v25, %v701_v58 }
 0x314   :  { %v1339_v31 = vpop.eup %1338 }
 0x315   :  { %v762_v0 = vmul.f32 %v1339_v31, %v761_v28 }
 0x317   :  { %v764_v33 = vadd.f32 %v763_v32, %v762_v0 }
 0x319   :  { %v767_v34 = vsel %vm766_vm4, %v764_v33, %v701_v58 }
 0x31a   :  { %v768_v36 = vpack.c.bf16 %v767_v34, %v767_v34 }
 0x31c   :  { %1238 = vmatmul.msk.bf16.vlgmr.msrb.gmra.mxu0 %vm196_vm6, %v768_v36  ;;  %1239 = vmatmul.msk.bf16.vlgmr.msrb.gmra.mxu1 %vm196_vm6, %v768_v36 }
 0x31d   :  { %1240 = vmatmul.msk.bf16.vlgmr.msrb.gmra.mxu2 %vm196_vm6, %v768_v36  ;;  %947 = vmatpush.bf16.msrb.mxu0 %v1588_v43 }
 0x31e   :  { %975 = vmatpush.bf16.msrb.mxu1 %v1506_v10  ;;  %994 = vmatpush.bf16.msrb.mxu2 %v1532_v21  ;;  %v769_v10 = vld [vmem:[#allocation2 + $0x20] sm:$0xff] }
 0x321   :  { %948 = vmatpush.bf16.msrb.mxu0 %v1601_v47 }
 0x322   :  { %976 = vmatpush.bf16.msrb.mxu1 %v1512_v13  ;;  %995 = vmatpush.bf16.msrb.mxu2 %v1536_v24 }
 0x325   :  { %949 = vmatpush.bf16.msrb.mxu0 %v1607_v48 }
 0x326   :  { %977 = vmatpush.bf16.msrb.mxu1 %v1518_v16  ;;  %996 = vmatpush.bf16.msrb.mxu2 %v1564_v35 }
 0x329   :  { %950 = vmatpush.bf16.msrb.mxu0 %v1613_v49 }
 0x32a   :  { %978 = vmatpush.bf16.msrb.mxu1 %v1527_v19  ;;  %997 = vmatpush.bf16.msrb.mxu2 %v1576_v39 }
 0x399   :  { %v782_v21 = vpop.f32.mrf.mxu0  ;;  %v801_v37 = vpop.f32.mrf.mxu1 }
 0x39a   :  { %v786_v38 = vadd.f32 %v782_v21, %v769_v10  ;;  %v805_v13 = vadd.f32 %v801_v37, %v791_v14  ;;  %v901_v10 = vld [vmem:[#allocation2 + $0x30] sm:$0xff] }
 0x39b   :  { %v923_v14 = vld [vmem:[#allocation2 + $0x70] sm:$0xff] }
 0x39c   :  { %v787_v50 = vmul.f32 0.5, %v786_v38  ;;  %v806_v24 = vmul.f32 0.5, %v805_v13 }
 0x39e   :  { %1340 = vtanh.f32 %v787_v50 }
 0x39f   :  { %1342 = vtanh.f32 %v806_v24 }
 0x3a0   :  { %v820_v40 = vpop.f32.mrf.mxu2 }
 0x3a1   :  { %v784_v16 = vpop.f32.mrf.mxu0  ;;  %v803_v51 = vpop.f32.mrf.mxu1  ;;  %v821_v19 = vadd.f32 %v1765_v18, %v820_v40 }
 0x3a4   :  { %v1341_v35 = vpop.eup %1340 }
 0x3a5   :  { %v789_v41 = vmul.f32 0.5, %v1341_v35  ;;  %v1343_v42 = vpop.eup %1342 }
 0x3a6   :  { %v808_v46 = vmul.f32 0.5, %v1343_v42 }
 0x3a7   :  { %v790_v44 = vadd.f32 0.5, %v789_v41 }
 0x3a8   :  { %v822_v39 = vpop.f32.mrf.mxu2  ;;  %v809_v55 = vadd.f32 0.5, %v808_v46 }
 0x3a9   :  { %v824_v45 = vmul.f32 %v821_v19, %v790_v44  ;;  %v942_v39 = vld [vmem:[#allocation2 + $0xb0] sm:$0xff] }
 0x3aa   :  { %v827_v56 = vsub.f32 1.0, %v809_v55  ;;  %v829_v59 = vmul.f32 %v809_v55, %v767_v34 }
 0x3ab   :  { %v825_v54 = vadd.f32 %v824_v45, %v810_v52 }
 0x3ad   :  { %1344 = vtanh.f32 %v825_v54 }
 0x3b3   :  { %v1345_v58 = vpop.eup %1344 }
 0x3b4   :  { %v828_v26 = vmul.f32 %v1345_v58, %v827_v56 }
 0x3b6   :  { %v830_v60 = vadd.f32 %v829_v59, %v828_v26 }
 0x3b8   :  { %v833_v57 = vsel %vm832_vm5, %v830_v60, %v767_v34 }
 0x3b9   :  { %v834_v61 = vpack.c.bf16 %v833_v57, %v833_v57 }
 0x3bb   :  { %1241 = vmatmul.msk.bf16.vlgmr.msra.gmra.mxu3 %vm196_vm6, %v834_v61  ;;  %1242 = vmatmul.msk.bf16.vlgmr.msra.gmra.mxu0 %vm196_vm6, %v834_v61 }
 0x3bc   :  { %1243 = vmatmul.msk.bf16.vlgmr.msra.gmra.mxu1 %vm196_vm6, %v834_v61  ;;  %1013 = vmatpush.bf16.msra.mxu3 %v1588_v43  ;;  %v1293_v61 = vld [vmem:[%s1938_s7 + $0x10] sm:$0xff] }
 0x3c0   :  { %1014 = vmatpush.bf16.msra.mxu3 %v1601_v47 }
 0x3c4   :  { %1015 = vmatpush.bf16.msra.mxu3 %v1607_v48 }
 0x3c8   :  { %1016 = vmatpush.bf16.msra.mxu3 %v1613_v49 }
 0x438   :  { %v867_v62 = vpop.f32.mrf.mxu0 }
 0x439   :  { %v886_v63 = vpop.f32.mrf.mxu1  ;;  %v871_v17 = vadd.f32 %v867_v62, %v857_v1  ;;  %v1291_v62 = vld [vmem:[%s1938_s7] sm:$0xff] }
 0x43a   :  { %v887_v48 = vadd.f32 %v1765_v18, %v886_v63  ;;  %v967_v63 = vld [vmem:[#allocation2 + $0x38] sm:$0xff] }
 0x43b   :  { %v872_v8 = vmul.f32 0.5, %v871_v17 }
 0x43e   :  { %v848_v3 = vpop.f32.mrf.mxu3 }
 0x43f   :  { %v852_v4 = vadd.f32 %v848_v3, %v835_v2  ;;  %v989_v3 = vld [vmem:[#allocation2 + $0x78] sm:$0xff] }
 0x440   :  { %v869_v5 = vpop.f32.mrf.mxu0 }
 0x441   :  { %v853_v6 = vmul.f32 0.5, %v852_v4  ;;  %v888_v7 = vpop.f32.mrf.mxu1 }
 0x443   :  { %1346 = vtanh.f32 %v853_v6 }
 0x444   :  { %1348 = vtanh.f32 %v872_v8 }
 0x446   :  { %v850_v43 = vpop.f32.mrf.mxu3 }
 0x449   :  { %v1347_v53 = vpop.eup %1346 }
 0x44a   :  { %v855_v47 = vmul.f32 0.5, %v1347_v53  ;;  %v1349_v11 = vpop.eup %1348 }
 0x44b   :  { %v874_v9 = vmul.f32 0.5, %v1349_v11 }
 0x44c   :  { %v856_v49 = vadd.f32 0.5, %v855_v47 }
 0x44d   :  { %v875_v22 = vadd.f32 0.5, %v874_v9 }
 0x44e   :  { %v890_v23 = vmul.f32 %v887_v48, %v856_v49 }
 0x44f   :  { %v893_v25 = vsub.f32 1.0, %v875_v22  ;;  %v895_v31 = vmul.f32 %v875_v22, %v833_v57 }
 0x450   :  { %v891_v15 = vadd.f32 %v890_v23, %v876_v12  ;;  %v1008_v12 = vld [vmem:[#allocation2 + $0xb8] sm:$0xff] }
 0x452   :  { %1350 = vtanh.f32 %v891_v15 }
 0x458   :  { %v1351_v28 = vpop.eup %1350 }
 0x459   :  { %v894_v32 = vmul.f32 %v1351_v28, %v893_v25 }
 0x45b   :  { %v896_v0 = vadd.f32 %v895_v31, %v894_v32 }
 0x45d   :  { %v899_v33 = vsel %vm898_vm7, %v896_v0, %v833_v57  ;;  %v1294_v57 = vld [vmem:[%s1938_s7 + $0x18] sm:$0xff] }
 0x45e   :  { %v900_v34 = vpack.c.bf16 %v899_v33, %v899_v33  ;;  %1076 = vmatpush.bf16.msra.mxu0 %v1294_v57 }
 0x460   :  { %1244 = vmatmul.msk.bf16.vlgmr.msra.gmra.mxu2 %vm196_vm6, %v900_v34  ;;  %1245 = vmatmul.msk.bf16.vlgmr.msrb.gmra.mxu3 %vm196_vm6, %v900_v34 }
 0x461   :  { %1246 = vmatmul.msk.bf16.vlgmr.msrb.gmra.mxu0 %vm196_vm6, %v900_v34 }
 0x462   :  { %1077 = vmatpush.bf16.msra.mxu0 %v1293_v61 }
 0x466   :  { %1078 = vmatpush.bf16.msra.mxu0 %v1292_v29 }
 0x46a   :  { %1079 = vmatpush.bf16.msra.mxu0 %v1291_v62 }
 0x4de   :  { %v952_v36 = vpop.f32.mrf.mxu0 }
 0x4df   :  { %v953_v42 = vadd.f32 %v1765_v18, %v952_v36 }
 0x4e3   :  { %v914_v21 = vpop.f32.mrf.mxu2  ;;  %v933_v37 = vpop.f32.mrf.mxu3 }
 0x4e4   :  { %v918_v38 = vadd.f32 %v914_v21, %v901_v10  ;;  %v937_v13 = vadd.f32 %v933_v37, %v923_v14 }
 0x4e6   :  { %v919_v50 = vmul.f32 0.5, %v918_v38  ;;  %v954_v24 = vpop.f32.mrf.mxu0  ;;  %v938_v40 = vmul.f32 0.5, %v937_v13 }
 0x4e8   :  { %1352 = vtanh.f32 %v919_v50 }
 0x4e9   :  { %1354 = vtanh.f32 %v938_v40 }
 0x4eb   :  { %v916_v20 = vpop.f32.mrf.mxu2  ;;  %v935_v16 = vpop.f32.mrf.mxu3 }
 0x4ee   :  { %v1353_v51 = vpop.eup %1352 }
 0x4ef   :  { %v921_v35 = vmul.f32 0.5, %v1353_v51  ;;  %v1355_v41 = vpop.eup %1354 }
 0x4f0   :  { %v940_v45 = vmul.f32 0.5, %v1355_v41 }
 0x4f1   :  { %v922_v44 = vadd.f32 0.5, %v921_v35 }
 0x4f2   :  { %v941_v52 = vadd.f32 0.5, %v940_v45 }
 0x4f3   :  { %v956_v19 = vmul.f32 %v953_v42, %v922_v44 }
 0x4f4   :  { %v959_v54 = vsub.f32 1.0, %v941_v52  ;;  %v961_v58 = vmul.f32 %v941_v52, %v899_v33 }
 0x4f5   :  { %v957_v46 = vadd.f32 %v956_v19, %v942_v39 }
 0x4f7   :  { %1356 = vtanh.f32 %v957_v46 }
 0x4fd   :  { %v1357_v55 = vpop.eup %1356 }
 0x4fe   :  { %v960_v56 = vmul.f32 %v1357_v55, %v959_v54 }
 0x500   :  { %v962_v59 = vadd.f32 %v961_v58, %v960_v56 }
 0x502   :  { %v965_v26 = vsel %vm964_vm10, %v962_v59, %v899_v33 }
 0x503   :  { %v966_v60 = vpack.c.bf16 %v965_v26, %v965_v26 }
 0x505   :  { %1247 = vmatmul.msk.bf16.vlgmr.msrb.gmra.mxu1 %vm196_vm6, %v966_v60  ;;  %1248 = vmatmul.msk.bf16.vlgmr.msrb.gmra.mxu2 %vm196_vm6, %v966_v60 }
 0x506   :  { %1249 = vmatmul.msk.bf16.vlgmr.msra.gmra.mxu3 %vm196_vm6, %v966_v60 }
 0x582   :  { %v980_v1 = vpop.f32.mrf.mxu1 }
 0x583   :  { %v984_v17 = vadd.f32 %v980_v1, %v967_v63 }
 0x585   :  { %v985_v2 = vmul.f32 0.5, %v984_v17 }
 0x587   :  { %1358 = vtanh.f32 %v985_v2 }
 0x588   :  { %v999_v4 = vpop.f32.mrf.mxu2 }
 0x589   :  { %v1003_v5 = vadd.f32 %v999_v4, %v989_v3  ;;  %v1018_v6 = vpop.f32.mrf.mxu3 }
 0x58a   :  { %v982_v7 = vpop.f32.mrf.mxu1  ;;  %v1019_v11 = vadd.f32 %v1765_v18, %v1018_v6  ;;  %v1315_v18 = vld [vmem:[%s1939_s8] ss:$0 sm:$0xff] }
 0x58b   :  { %v1004_v8 = vmul.f32 0.5, %v1003_v5 }
 0x58d   :  { %v1359_v43 = vpop.eup %1358  ;;  %1360 = vtanh.f32 %v1004_v8 }
 0x58e   :  { %v987_v53 = vmul.f32 0.5, %v1359_v43 }
 0x590   :  { %v988_v47 = vadd.f32 0.5, %v987_v53  ;;  %v1001_v48 = vpop.f32.mrf.mxu2 }
 0x591   :  { %v1020_v49 = vpop.f32.mrf.mxu3 }
 0x592   :  { %v1022_v23 = vmul.f32 %v1019_v11, %v988_v47 }
 0x593   :  { %v1361_v9 = vpop.eup %1360 }
 0x594   :  { %v1006_v15 = vmul.f32 0.5, %v1361_v9  ;;  %v1023_v22 = vadd.f32 %v1022_v23, %v1008_v12 }
 0x596   :  { %1362 = vtanh.f32 %v1023_v22  ;;  %v1007_v25 = vadd.f32 0.5, %v1006_v15 }
 0x598   :  { %v1025_v28 = vsub.f32 1.0, %v1007_v25  ;;  %v1027_v32 = vmul.f32 %v1007_v25, %v965_v26 }
 0x59c   :  { %v1363_v31 = vpop.eup %1362 }
 0x59d   :  { %v1026_v0 = vmul.f32 %v1363_v31, %v1025_v28 }
 0x59f   :  { %v1028_v33 = vadd.f32 %v1027_v32, %v1026_v0 }
 0x5a1   :  { %v1031_v34 = vsel %vm1030_vm11, %v1028_v33, %v965_v26 }
 0x5a2   :  { %v1032_v36 = vpack.c.bf16 %v1031_v34, %v1031_v34 }
 0x5a4   :  { %1266 = vmatmul.msk.bf16.vlgmr.msra.gmra.mxu0 %vm196_vm6, %v1032_v36 }
 0x621   :  { %v1081_v10 = vpop.f32.mrf.mxu0 }
 0x622   :  { %v1082_v21 = vadd.f32 %v1315_v18, %v1081_v10 }
 0x624   :  { %1085 = vst [vmem:[#allocation6] sm:$0xff] %v1082_v21 }
 0x625   :  { %1096 = dma.vmem_to_hbm [thread:$0]  %s1092_s17, 128, %s1094_s19, [#allocation5]  }
 0x629   :  { %v1083_v27 = vpop.f32.mrf.mxu0 }
 0x62a   :  { %1414 = dma.done.wait [#allocation5], 128  }
 0x62b   :  { %1415 = vsyncadd [#allocation5], 4294967168 }
 0x62c   :  { %1101 = vsyncpa [#allocation4], 1 }
 0x62d   :  { %1102 = vsyncpa [#allocation5], 1 }

</bundles_post_ra>
